<compile_context>
chip_gen: v6e
topology: v6e:2x2x1
jax: 0.10.0
libtpu: 0.0.40
codegen_flags: <defaults>
</compile_context>

<pallas_src>
import numpy as np

import jax
import jax.numpy as jnp
from jax.experimental import pallas as pl
from jax.experimental.pallas import tpu as pltpu

NEG_SLOPE = 0.01     # F.leaky_relu default
BN_EPS = 1e-5        # nn.BatchNorm2d default


# ----------------------------- Pallas kernels ------------------------------

def _conv_lrelu_kernel(p_ref, w_ref, b_ref, o_ref):
    """Row tile of conv1: y = patches @ W + b ; leaky_relu ; bf16 store."""
    y = jnp.dot(p_ref[...], w_ref[...], preferred_element_type=jnp.float32)
    y = y + b_ref[...]
    o_ref[...] = jnp.where(y > 0, y, NEG_SLOPE * y).astype(o_ref.dtype)


def _conv_bn_lrelu_kernel(p_ref, w_ref, b_ref, g_ref, bt_ref, o_ref):
    """Whole layer in one grid step: matmul + bias -> train-mode BN -> leaky_relu -> bf16."""
    y = jnp.dot(p_ref[...], w_ref[...], preferred_element_type=jnp.float32)
    y = y + b_ref[...]
    mean = jnp.mean(y, axis=0, keepdims=True)                 # stats over all (n, oh, ow) rows
    d = y - mean
    var = jnp.mean(d * d, axis=0, keepdims=True)              # biased, centered (no cancellation)
    z = d * (g_ref[...] * jax.lax.rsqrt(var + BN_EPS)) + bt_ref[...]
    o_ref[...] = jnp.where(z > 0, z, NEG_SLOPE * z).astype(o_ref.dtype)


def _conv_bn_lrelu_fc_sigmoid_kernel(p_ref, w_ref, b_ref, g_ref, bt_ref,
                                     w4_ref, d4_ref, g4_ref, b4_ref, o_ref):
    """conv3 + BN + leaky_relu fused with fc4 + sigmoid on the VMEM-resident activation.

    Rows of h are ordered (n, oh, ow); lanes are channels.  fc4 (already permuted to (h, w, c)
    column order) is applied as:  out[n] = sum_m g4[n, m] * sum_c h[m, c] * (d4 @ w4)[m, c] + b4
    where d4 replicates the (R, C) fc weights across the batch and g4 sums each batch group.
    """
    y = jnp.dot(p_ref[...], w_ref[...], preferred_element_type=jnp.float32)
    y = y + b_ref[...]
    mean = jnp.mean(y, axis=0, keepdims=True)
    d = y - mean
    var = jnp.mean(d * d, axis=0, keepdims=True)
    h = d * (g_ref[...] * jax.lax.rsqrt(var + BN_EPS)) + bt_ref[...]
    h = jnp.where(h > 0, h, NEG_SLOPE * h)                                    # (M, C) f32

    w4rep = jnp.dot(d4_ref[...], w4_ref[...], preferred_element_type=jnp.float32)  # (M, C)
    t = jnp.dot(g4_ref[...], h * w4rep, preferred_element_type=jnp.float32)        # (N, C)
    logits = jnp.sum(t, axis=1, keepdims=True) + b4_ref[...]                       # (N, 1)
    o_ref[...] = 1.0 / (1.0 + jnp.exp(-logits))


# ------------------------------ call wrappers -------------------------------

def _round_up(x, m):
    return (x + m - 1) // m * m


def conv_lrelu(patches, w_mat, b):
    """conv1: row-tiled matmul + bias + leaky_relu; 2-step parallel grid for v7x megacore."""
    M, K = patches.shape
    C = w_mat.shape[1]
    if M >= 128:
        tm = _round_up((M + 1) // 2, 16)     # bf16-friendly row tile
        m_pad, grid = 2 * tm, 2
    else:
        tm, m_pad, grid = M, M, 1            # exact single tile: no pad / slice / mask
    p = patches if m_pad == M else jnp.pad(patches, ((0, m_pad - M), (0, 0)))
    out = pl.pallas_call(
        _conv_lrelu_kernel,
        out_shape=jax.ShapeDtypeStruct((m_pad, C), jnp.bfloat16),
        grid=(grid,),
        in_specs=[pl.BlockSpec((tm, K), lambda i: (i, 0)),
                  pl.BlockSpec((K, C), lambda i: (0, 0)),
                  pl.BlockSpec((1, C), lambda i: (0, 0))],
        out_specs=pl.BlockSpec((tm, C), lambda i: (i, 0)),
        compiler_params=pltpu.CompilerParams(dimension_semantics=("parallel",)),
    )(p, w_mat, b)
    return out if m_pad == M else out[:M]


def conv_bn_lrelu(patches, w_mat, b, gamma, beta):
    """conv + train-mode BN + leaky_relu, single fused pass (whole layer fits in VMEM)."""
    M, K = patches.shape
    C = w_mat.shape[1]
    return pl.pallas_call(
        _conv_bn_lrelu_kernel,
        out_shape=jax.ShapeDtypeStruct((M, C), jnp.bfloat16),
        grid=(1,),
        in_specs=[pl.BlockSpec((M, K), lambda i: (0, 0)),
                  pl.BlockSpec((K, C), lambda i: (0, 0)),
                  pl.BlockSpec((1, C), lambda i: (0, 0)),
                  pl.BlockSpec((1, C), lambda i: (0, 0)),
                  pl.BlockSpec((1, C), lambda i: (0, 0))],
        out_specs=pl.BlockSpec((M, C), lambda i: (0, 0)),
        compiler_params=pltpu.CompilerParams(dimension_semantics=("arbitrary",)),
    )(patches, w_mat, b, gamma, beta)


def conv_bn_lrelu_fc_sigmoid(patches, w_mat, b, gamma, beta, w4s, b4, n_batch):
    """conv3 + BN + leaky_relu + fc4 + sigmoid in one kernel; returns (N, 1)."""
    M, K = patches.shape
    C = w_mat.shape[1]
    R = w4s.shape[0]
    assert M == n_batch * R, (
        f"fc4 geometry mismatch: conv3 produces {M // n_batch} spatial positions per sample "
        f"but fc4 expects {R}")
    # jit-time constants: d4 replicates fc rows per batch element, g4 sums each batch group.
    d4 = np.kron(np.ones((n_batch, 1), np.float32), np.eye(R, dtype=np.float32))   # (M, R)
    g4 = np.kron(np.eye(n_batch, dtype=np.float32), np.ones((1, R), np.float32))   # (N, M)
    return pl.pallas_call(
        _conv_bn_lrelu_fc_sigmoid_kernel,
        out_shape=jax.ShapeDtypeStruct((n_batch, 1), jnp.float32),
        grid=(1,),
        in_specs=[pl.BlockSpec((M, K), lambda i: (0, 0)),
                  pl.BlockSpec((K, C), lambda i: (0, 0)),
                  pl.BlockSpec((1, C), lambda i: (0, 0)),
                  pl.BlockSpec((1, C), lambda i: (0, 0)),
                  pl.BlockSpec((1, C), lambda i: (0, 0)),
                  pl.BlockSpec((R, C), lambda i: (0, 0)),
                  pl.BlockSpec((M, R), lambda i: (0, 0)),
                  pl.BlockSpec((n_batch, M), lambda i: (0, 0)),
                  pl.BlockSpec((1, 1), lambda i: (0, 0))],
        out_specs=pl.BlockSpec((n_batch, 1), lambda i: (0, 0)),
        compiler_params=pltpu.CompilerParams(dimension_semantics=("arbitrary",)),
    )(patches, w_mat, b, gamma, beta, w4s, d4, g4, b4)


# --------------------------------- glue -------------------------------------

def im2col_nhwc(x, k=3, s=2):
    """x: (N, H, W, C) -> patches (N*OH*OW, k*k*C); rows (n, oh, ow), cols (kh, kw, c)."""
    N, H, W, C = x.shape
    OH = (H - k) // s + 1
    OW = (W - k) // s + 1
    cols = []
    for kh in range(k):
        for kw in range(k):
            cols.append(x[:, kh:kh + s * OH:s, kw:kw + s * OW:s, :])   # (N, OH, OW, C)
    p = jnp.stack(cols, axis=3)                                        # (N, OH, OW, k*k, C)
    return p.reshape(N * OH * OW, k * k * C), OH, OW


def make_params(key, in_ch):
    """Torch-layout parameters (Conv: OIHW, Linear: (out, in) with NCHW flatten order)."""
    ks = jax.random.split(key, 8)

    def u(k, shape, scale=0.05):
        return jax.random.uniform(k, shape, jnp.float32, -scale, scale)

    fc_in = 1024 if in_ch == 1 else 2304
    return dict(
        w1=u(ks[0], (64, in_ch, 3, 3)), b1=u(ks[1], (64,)),
        w2=u(ks[2], (128, 64, 3, 3)), b2=u(ks[3], (128,)),
        g2=jnp.ones((128,), jnp.float32), be2=jnp.zeros((128,), jnp.float32),
        w3=u(ks[4], (256, 128, 3, 3)), b3=u(ks[5], (256,)),
        g3=jnp.ones((256,), jnp.float32), be3=jnp.zeros((256,), jnp.float32),
        w4=u(ks[6], (1, fc_in)), b4=u(ks[7], (1,)),
    )


def prepare_params(params):
    """One-time, out-of-hot-path weight prep (layout permutes + bf16 casts)."""
    def wmat(w):
        # (Cout, Cin, KH, KW) -> (KH*KW*Cin, Cout), matching im2col (kh, kw, ci) column order.
        co, ci, kh, kw = w.shape
        return w.transpose(2, 3, 1, 0).reshape(kh * kw * ci, co).astype(jnp.bfloat16)

    c3 = params['w3'].shape[0]                    # 256
    r3 = params['w4'].shape[1] // c3              # spatial positions after conv3
    # torch flattens NCHW as (c, h, w); reorder fc4 columns to (h, w, c) == our row/lane layout.
    w4s = params['w4'].reshape(c3, r3).T.astype(jnp.float32)   # (R3, 256)

    f32 = jnp.float32
    return dict(
        w1m=wmat(params['w1']), b1=params['b1'].reshape(1, -1).astype(f32),
        w2m=wmat(params['w2']), b2=params['b2'].reshape(1, -1).astype(f32),
        g2=params['g2'].reshape(1, -1).astype(f32), be2=params['be2'].reshape(1, -1).astype(f32),
        w3m=wmat(params['w3']), b3=params['b3'].reshape(1, -1).astype(f32),
        g3=params['g3'].reshape(1, -1).astype(f32), be3=params['be3'].reshape(1, -1).astype(f32),
        w4s=w4s, b4=params['b4'].reshape(1, 1).astype(f32),
    )


def discriminator_forward(x, kp):
    n = x.shape[0]
    h = jnp.transpose(x, (0, 2, 3, 1)).astype(jnp.bfloat16)   # single NCHW->NHWC + bf16 on entry

    # conv1 + leaky_relu
    p1, oh1, ow1 = im2col_nhwc(h)
    h1 = conv_lrelu(p1, kp['w1m'], kp['b1'])
    h1 = h1.reshape(n, oh1, ow1, kp['w1m'].shape[1])

    # conv2 + bn2 + leaky_relu (fused, single pass)
    p2, oh2, ow2 = im2col_nhwc(h1)
    h2 = conv_bn_lrelu(p2, kp['w2m'], kp['b2'], kp['g2'], kp['be2'])
    h2 = h2.reshape(n, oh2, ow2, kp['w2m'].shape[1])

    # conv3 + bn3 + leaky_relu + fc4 + sigmoid (fully fused)
    p3, _, _ = im2col_nhwc(h2)
    return conv_bn_lrelu_fc_sigmoid(p3, kp['w3m'], kp['b3'], kp['g3'], kp['be3'],
                                    kp['w4s'], kp['b4'], n)


# ----------------------------- pure-JAX reference ----------------------------

def _ref_forward(x, params):
    def conv(h, w, b):
        y = jax.lax.conv_general_dilated(
            h, w, window_strides=(2, 2), padding='VALID',
            dimension_numbers=('NCHW', 'OIHW', 'NCHW'))
        return y + b.reshape(1, -1, 1, 1)

    def bn(y, g, be):
        mean = y.mean(axis=(0, 2, 3), keepdims=True)
        var = ((y - mean) ** 2).mean(axis=(0, 2, 3), keepdims=True)  # biased (train-mode)
        return ((y - mean) * jax.lax.rsqrt(var + BN_EPS)
                * g.reshape(1, -1, 1, 1) + be.reshape(1, -1, 1, 1))

    lrelu = lambda t: jnp.where(t > 0, t, NEG_SLOPE * t)
    h = lrelu(conv(x, params['w1'], params['b1']))
    h = lrelu(bn(conv(h, params['w2'], params['b2']), params['g2'], params['be2']))
    h = lrelu(bn(conv(h, params['w3'], params['b3']), params['g3'], params['be3']))
    h = h.reshape(h.shape[0], -1)
    y = h @ params['w4'].T + params['b4']
    return 1.0 / (1.0 + jnp.exp(-y))


if __name__ == "__main__":
    key = jax.random.PRNGKey(0)
    k_x, k_p = jax.random.split(key)

    in_ch = 3
    x = jax.random.normal(k_x, (2, in_ch, 32, 32), jnp.float32)  # NCHW; 32x32 -> fc_in=2304
    params = make_params(k_p, in_ch)
    kernel_params = prepare_params(params)                       # one-time weight prep

    fwd = jax.jit(discriminator_forward)
    out = jax.block_until_ready(fwd(x, kernel_params))
    assert out.shape == (2, 1)
    assert bool(jnp.all((out >= 0.0) & (out <= 1.0)))

    # f32 XLA reference (bf16 MXU operands / bf16 layer boundaries -> loose tolerance)
    ref = jax.block_until_ready(_ref_forward(x, params))
    assert bool(jnp.max(jnp.abs(out - ref)) < 5e-2), float(jnp.max(jnp.abs(out - ref)))

    print("KERNEL_OK")
</pallas_src>

<mosaic_0001>
module attributes {stable_mosaic.version = 11 : i64} {
  func.func @_conv_lrelu_kernel(%arg0: i32, %arg1: memref<240x27xbf16, #tpu.memory_space<vmem>>, %arg2: memref<27x64xbf16, #tpu.memory_space<vmem>>, %arg3: memref<1x64xf32, #tpu.memory_space<vmem>>, %arg4: memref<240x64xbf16, #tpu.memory_space<vmem>>) attributes {dimension_semantics = [#tpu.dimension_semantics<parallel>], iteration_bounds = array<i64: 2>, scalar_prefetch = 0 : i64, scratch_operands = 0 : i64, tpu.core_type = #tpu.core_type<tc>, window_params = [{transform_indices = @transform_0, window_bounds = array<i64: 240, 27>}, {pipeline_mode = #tpu.pipeline_mode<synchronous>, transform_indices = @transform_1, window_bounds = array<i64: 27, 64>}, {pipeline_mode = #tpu.pipeline_mode<synchronous>, transform_indices = @transform_2, window_bounds = array<i64: 1, 64>}, {transform_indices = @transform_3, window_bounds = array<i64: 240, 64>}]} {
    %c0 = arith.constant 0 : index
    %c0_0 = arith.constant 0 : index
    %0 = vector.load %arg1[%c0, %c0_0] : memref<240x27xbf16, #tpu.memory_space<vmem>>, vector<240x27xbf16>
    %c0_1 = arith.constant 0 : index
    %c0_2 = arith.constant 0 : index
    %1 = vector.load %arg2[%c0_1, %c0_2] : memref<27x64xbf16, #tpu.memory_space<vmem>>, vector<27x64xbf16>
    %cst = arith.constant dense<0.000000e+00> : vector<240x64xf32>
    %2 = tpu.matmul %0, %1, %cst {dimension_numbers = #tpu.dot_dimension_numbers<[1], [0], [0], [1], [0, 0, 1, 1], [], []>} : vector<240x27xbf16>, vector<27x64xbf16>, vector<240x64xf32> -> vector<240x64xf32>
    %c0_3 = arith.constant 0 : index
    %c0_4 = arith.constant 0 : index
    %3 = vector.load %arg3[%c0_3, %c0_4] : memref<1x64xf32, #tpu.memory_space<vmem>>, vector<1x64xf32>
    %4 = vector.broadcast %3 : vector<1x64xf32> to vector<240x64xf32>
    %5 = arith.addf %2, %4 : vector<240x64xf32>
    %cst_5 = arith.constant 0.000000e+00 : f32
    %6 = vector.broadcast %cst_5 : f32 to vector<240x64xf32>
    %7 = arith.cmpf ogt, %5, %6 : vector<240x64xf32>
    %cst_6 = arith.constant 0.00999999977 : f32
    %8 = vector.broadcast %cst_6 : f32 to vector<240x64xf32>
    %9 = arith.mulf %8, %5 : vector<240x64xf32>
    %10 = arith.select %7, %5, %9 : vector<240x64xi1>, vector<240x64xf32>
    %11 = arith.truncf %10 : vector<240x64xf32> to vector<240x64xbf16>
    %c0_7 = arith.constant 0 : index
    %c0_8 = arith.constant 0 : index
    %12 = vector.load %arg4[%c0_7, %c0_8] : memref<240x64xbf16, #tpu.memory_space<vmem>>, vector<240x64xbf16>
    tpu.vector_store %arg4[%c0_7, %c0_8], %11 {strides = array<i32>} : memref<240x64xbf16, #tpu.memory_space<vmem>>, vector<240x64xbf16>,
    return
  }
  func.func @transform_0(%arg0: i32) -> (i32, i32) {
    %c0_i32 = arith.constant 0 : i32
    %c0_i32_0 = arith.constant 0 : i32
    return %arg0, %c0_i32 : i32, i32
  }
  func.func @transform_1(%arg0: i32) -> (i32, i32) {
    %c0_i32 = arith.constant 0 : i32
    %c0_i32_0 = arith.constant 0 : i32
    %c0_i32_1 = arith.constant 0 : i32
    return %c0_i32, %c0_i32_0 : i32, i32
  }
  func.func @transform_2(%arg0: i32) -> (i32, i32) {
    %c0_i32 = arith.constant 0 : i32
    %c0_i32_0 = arith.constant 0 : i32
    %c0_i32_1 = arith.constant 0 : i32
    return %c0_i32, %c0_i32_0 : i32, i32
  }
  func.func @transform_3(%arg0: i32) -> (i32, i32) {
    %c0_i32 = arith.constant 0 : i32
    %c0_i32_0 = arith.constant 0 : i32
    return %arg0, %c0_i32 : i32, i32
  }
}

module attributes {stable_mosaic.version = 11 : i64} {
  func.func @_conv_bn_lrelu_kernel(%arg0: i32, %arg1: memref<98x576xbf16, #tpu.memory_space<vmem>>, %arg2: memref<576x128xbf16, #tpu.memory_space<vmem>>, %arg3: memref<1x128xf32, #tpu.memory_space<vmem>>, %arg4: memref<1x128xf32, #tpu.memory_space<vmem>>, %arg5: memref<1x128xf32, #tpu.memory_space<vmem>>, %arg6: memref<98x128xbf16, #tpu.memory_space<vmem>>) attributes {dimension_semantics = [#tpu.dimension_semantics<arbitrary>], iteration_bounds = array<i64: 1>, scalar_prefetch = 0 : i64, scratch_operands = 0 : i64, tpu.core_type = #tpu.core_type<tc>, window_params = [{pipeline_mode = #tpu.pipeline_mode<synchronous>, transform_indices = @transform_0, window_bounds = array<i64: 98, 576>}, {pipeline_mode = #tpu.pipeline_mode<synchronous>, transform_indices = @transform_1, window_bounds = array<i64: 576, 128>}, {pipeline_mode = #tpu.pipeline_mode<synchronous>, transform_indices = @transform_2, window_bounds = array<i64: 1, 128>}, {pipeline_mode = #tpu.pipeline_mode<synchronous>, transform_indices = @transform_3, window_bounds = array<i64: 1, 128>}, {pipeline_mode = #tpu.pipeline_mode<synchronous>, transform_indices = @transform_4, window_bounds = array<i64: 1, 128>}, {pipeline_mode = #tpu.pipeline_mode<synchronous>, transform_indices = @transform_5, window_bounds = array<i64: 98, 128>}]} {
    %c0 = arith.constant 0 : index
    %c0_0 = arith.constant 0 : index
    %0 = vector.load %arg1[%c0, %c0_0] : memref<98x576xbf16, #tpu.memory_space<vmem>>, vector<98x576xbf16>
    %c0_1 = arith.constant 0 : index
    %c0_2 = arith.constant 0 : index
    %1 = vector.load %arg2[%c0_1, %c0_2] : memref<576x128xbf16, #tpu.memory_space<vmem>>, vector<576x128xbf16>
    %cst = arith.constant dense<0.000000e+00> : vector<98x128xf32>
    %2 = tpu.matmul %0, %1, %cst {dimension_numbers = #tpu.dot_dimension_numbers<[1], [0], [0], [1], [0, 0, 1, 1], [], []>} : vector<98x576xbf16>, vector<576x128xbf16>, vector<98x128xf32> -> vector<98x128xf32>
    %c0_3 = arith.constant 0 : index
    %c0_4 = arith.constant 0 : index
    %3 = vector.load %arg3[%c0_3, %c0_4] : memref<1x128xf32, #tpu.memory_space<vmem>>, vector<1x128xf32>
    %4 = vector.broadcast %3 : vector<1x128xf32> to vector<98x128xf32>
    %5 = arith.addf %2, %4 : vector<98x128xf32>
    %cst_5 = arith.constant dense<0.000000e+00> : vector<128xf32>
    %6 = vector.multi_reduction <add>, %5, %cst_5 [0] : vector<98x128xf32> to vector<128xf32>
    %7 = vector.shape_cast %6 : vector<128xf32> to vector<1x128xf32>
    %cst_6 = arith.constant 9.800000e+01 : f32
    %8 = vector.broadcast %cst_6 : f32 to vector<1x128xf32>
    %9 = arith.divf %7, %8 : vector<1x128xf32>
    %10 = vector.broadcast %9 : vector<1x128xf32> to vector<98x128xf32>
    %11 = arith.subf %5, %10 : vector<98x128xf32>
    %12 = arith.mulf %11, %11 : vector<98x128xf32>
    %cst_7 = arith.constant dense<0.000000e+00> : vector<128xf32>
    %13 = vector.multi_reduction <add>, %12, %cst_7 [0] : vector<98x128xf32> to vector<128xf32>
    %14 = vector.shape_cast %13 : vector<128xf32> to vector<1x128xf32>
    %cst_8 = arith.constant 9.800000e+01 : f32
    %15 = vector.broadcast %cst_8 : f32 to vector<1x128xf32>
    %16 = arith.divf %14, %15 : vector<1x128xf32>
    %c0_9 = arith.constant 0 : index
    %c0_10 = arith.constant 0 : index
    %17 = vector.load %arg4[%c0_9, %c0_10] : memref<1x128xf32, #tpu.memory_space<vmem>>, vector<1x128xf32>
    %cst_11 = arith.constant 9.99999974E-6 : f32
    %18 = vector.broadcast %cst_11 : f32 to vector<1x128xf32>
    %19 = arith.addf %16, %18 : vector<1x128xf32>
    %20 = math.rsqrt %19 : vector<1x128xf32>
    %21 = arith.mulf %17, %20 : vector<1x128xf32>
    %22 = vector.broadcast %21 : vector<1x128xf32> to vector<98x128xf32>
    %23 = arith.mulf %11, %22 : vector<98x128xf32>
    %c0_12 = arith.constant 0 : index
    %c0_13 = arith.constant 0 : index
    %24 = vector.load %arg5[%c0_12, %c0_13] : memref<1x128xf32, #tpu.memory_space<vmem>>, vector<1x128xf32>
    %25 = vector.broadcast %24 : vector<1x128xf32> to vector<98x128xf32>
    %26 = arith.addf %23, %25 : vector<98x128xf32>
    %cst_14 = arith.constant 0.000000e+00 : f32
    %27 = vector.broadcast %cst_14 : f32 to vector<98x128xf32>
    %28 = arith.cmpf ogt, %26, %27 : vector<98x128xf32>
    %cst_15 = arith.constant 0.00999999977 : f32
    %29 = vector.broadcast %cst_15 : f32 to vector<98x128xf32>
    %30 = arith.mulf %29, %26 : vector<98x128xf32>
    %31 = arith.select %28, %26, %30 : vector<98x128xi1>, vector<98x128xf32>
    %32 = arith.truncf %31 : vector<98x128xf32> to vector<98x128xbf16>
    %c0_16 = arith.constant 0 : index
    %c0_17 = arith.constant 0 : index
    %33 = vector.load %arg6[%c0_16, %c0_17] : memref<98x128xbf16, #tpu.memory_space<vmem>>, vector<98x128xbf16>
    tpu.vector_store %arg6[%c0_16, %c0_17], %32 {strides = array<i32>} : memref<98x128xbf16, #tpu.memory_space<vmem>>, vector<98x128xbf16>,
    return
  }
  func.func @transform_0(%arg0: i32) -> (i32, i32) {
    %c0_i32 = arith.constant 0 : i32
    %c0_i32_0 = arith.constant 0 : i32
    %c0_i32_1 = arith.constant 0 : i32
    return %c0_i32, %c0_i32_0 : i32, i32
  }
  func.func @transform_1(%arg0: i32) -> (i32, i32) {
    %c0_i32 = arith.constant 0 : i32
    %c0_i32_0 = arith.constant 0 : i32
    %c0_i32_1 = arith.constant 0 : i32
    return %c0_i32, %c0_i32_0 : i32, i32
  }
  func.func @transform_2(%arg0: i32) -> (i32, i32) {
    %c0_i32 = arith.constant 0 : i32
    %c0_i32_0 = arith.constant 0 : i32
    %c0_i32_1 = arith.constant 0 : i32
    return %c0_i32, %c0_i32_0 : i32, i32
  }
  func.func @transform_3(%arg0: i32) -> (i32, i32) {
    %c0_i32 = arith.constant 0 : i32
    %c0_i32_0 = arith.constant 0 : i32
    %c0_i32_1 = arith.constant 0 : i32
    return %c0_i32, %c0_i32_0 : i32, i32
  }
  func.func @transform_4(%arg0: i32) -> (i32, i32) {
    %c0_i32 = arith.constant 0 : i32
    %c0_i32_0 = arith.constant 0 : i32
    %c0_i32_1 = arith.constant 0 : i32
    return %c0_i32, %c0_i32_0 : i32, i32
  }
  func.func @transform_5(%arg0: i32) -> (i32, i32) {
    %c0_i32 = arith.constant 0 : i32
    %c0_i32_0 = arith.constant 0 : i32
    %c0_i32_1 = arith.constant 0 : i32
    return %c0_i32, %c0_i32_0 : i32, i32
  }
}

module attributes {stable_mosaic.version = 11 : i64} {
  func.func @_conv_bn_lrelu_fc_sigmoid_kernel(%arg0: i32, %arg1: memref<18x1152xbf16, #tpu.memory_space<vmem>>, %arg2: memref<1152x256xbf16, #tpu.memory_space<vmem>>, %arg3: memref<1x256xf32, #tpu.memory_space<vmem>>, %arg4: memref<1x256xf32, #tpu.memory_space<vmem>>, %arg5: memref<1x256xf32, #tpu.memory_space<vmem>>, %arg6: memref<9x256xf32, #tpu.memory_space<vmem>>, %arg7: memref<18x9xf32, #tpu.memory_space<vmem>>, %arg8: memref<2x18xf32, #tpu.memory_space<vmem>>, %arg9: memref<1x1xf32, #tpu.memory_space<vmem>>, %arg10: memref<2x1xf32, #tpu.memory_space<vmem>>) attributes {dimension_semantics = [#tpu.dimension_semantics<arbitrary>], iteration_bounds = array<i64: 1>, scalar_prefetch = 0 : i64, scratch_operands = 0 : i64, tpu.core_type = #tpu.core_type<tc>, window_params = [{pipeline_mode = #tpu.pipeline_mode<synchronous>, transform_indices = @transform_0, window_bounds = array<i64: 18, 1152>}, {pipeline_mode = #tpu.pipeline_mode<synchronous>, transform_indices = @transform_1, window_bounds = array<i64: 1152, 256>}, {pipeline_mode = #tpu.pipeline_mode<synchronous>, transform_indices = @transform_2, window_bounds = array<i64: 1, 256>}, {pipeline_mode = #tpu.pipeline_mode<synchronous>, transform_indices = @transform_3, window_bounds = array<i64: 1, 256>}, {pipeline_mode = #tpu.pipeline_mode<synchronous>, transform_indices = @transform_4, window_bounds = array<i64: 1, 256>}, {pipeline_mode = #tpu.pipeline_mode<synchronous>, transform_indices = @transform_5, window_bounds = array<i64: 9, 256>}, {pipeline_mode = #tpu.pipeline_mode<synchronous>, transform_indices = @transform_6, window_bounds = array<i64: 18, 9>}, {pipeline_mode = #tpu.pipeline_mode<synchronous>, transform_indices = @transform_7, window_bounds = array<i64: 2, 18>}, {pipeline_mode = #tpu.pipeline_mode<synchronous>, transform_indices = @transform_8, window_bounds = array<i64: 1, 1>}, {pipeline_mode = #tpu.pipeline_mode<synchronous>, transform_indices = @transform_9, window_bounds = array<i64: 2, 1>}]} {
    %c0 = arith.constant 0 : index
    %c0_0 = arith.constant 0 : index
    %0 = vector.load %arg1[%c0, %c0_0] : memref<18x1152xbf16, #tpu.memory_space<vmem>>, vector<18x1152xbf16>
    %c0_1 = arith.constant 0 : index
    %c0_2 = arith.constant 0 : index
    %1 = vector.load %arg2[%c0_1, %c0_2] : memref<1152x256xbf16, #tpu.memory_space<vmem>>, vector<1152x256xbf16>
    %cst = arith.constant dense<0.000000e+00> : vector<18x256xf32>
    %2 = tpu.matmul %0, %1, %cst {dimension_numbers = #tpu.dot_dimension_numbers<[1], [0], [0], [1], [0, 0, 1, 1], [], []>} : vector<18x1152xbf16>, vector<1152x256xbf16>, vector<18x256xf32> -> vector<18x256xf32>
    %c0_3 = arith.constant 0 : index
    %c0_4 = arith.constant 0 : index
    %3 = vector.load %arg3[%c0_3, %c0_4] : memref<1x256xf32, #tpu.memory_space<vmem>>, vector<1x256xf32>
    %4 = vector.broadcast %3 : vector<1x256xf32> to vector<18x256xf32>
    %5 = arith.addf %2, %4 : vector<18x256xf32>
    %cst_5 = arith.constant dense<0.000000e+00> : vector<256xf32>
    %6 = vector.multi_reduction <add>, %5, %cst_5 [0] : vector<18x256xf32> to vector<256xf32>
    %7 = vector.shape_cast %6 : vector<256xf32> to vector<1x256xf32>
    %cst_6 = arith.constant 1.800000e+01 : f32
    %8 = vector.broadcast %cst_6 : f32 to vector<1x256xf32>
    %9 = arith.divf %7, %8 : vector<1x256xf32>
    %10 = vector.broadcast %9 : vector<1x256xf32> to vector<18x256xf32>
    %11 = arith.subf %5, %10 : vector<18x256xf32>
    %12 = arith.mulf %11, %11 : vector<18x256xf32>
    %cst_7 = arith.constant dense<0.000000e+00> : vector<256xf32>
    %13 = vector.multi_reduction <add>, %12, %cst_7 [0] : vector<18x256xf32> to vector<256xf32>
    %14 = vector.shape_cast %13 : vector<256xf32> to vector<1x256xf32>
    %cst_8 = arith.constant 1.800000e+01 : f32
    %15 = vector.broadcast %cst_8 : f32 to vector<1x256xf32>
    %16 = arith.divf %14, %15 : vector<1x256xf32>
    %c0_9 = arith.constant 0 : index
    %c0_10 = arith.constant 0 : index
    %17 = vector.load %arg4[%c0_9, %c0_10] : memref<1x256xf32, #tpu.memory_space<vmem>>, vector<1x256xf32>
    %cst_11 = arith.constant 9.99999974E-6 : f32
    %18 = vector.broadcast %cst_11 : f32 to vector<1x256xf32>
    %19 = arith.addf %16, %18 : vector<1x256xf32>
    %20 = math.rsqrt %19 : vector<1x256xf32>
    %21 = arith.mulf %17, %20 : vector<1x256xf32>
    %22 = vector.broadcast %21 : vector<1x256xf32> to vector<18x256xf32>
    %23 = arith.mulf %11, %22 : vector<18x256xf32>
    %c0_12 = arith.constant 0 : index
    %c0_13 = arith.constant 0 : index
    %24 = vector.load %arg5[%c0_12, %c0_13] : memref<1x256xf32, #tpu.memory_space<vmem>>, vector<1x256xf32>
    %25 = vector.broadcast %24 : vector<1x256xf32> to vector<18x256xf32>
    %26 = arith.addf %23, %25 : vector<18x256xf32>
    %cst_14 = arith.constant 0.000000e+00 : f32
    %27 = vector.broadcast %cst_14 : f32 to vector<18x256xf32>
    %28 = arith.cmpf ogt, %26, %27 : vector<18x256xf32>
    %cst_15 = arith.constant 0.00999999977 : f32
    %29 = vector.broadcast %cst_15 : f32 to vector<18x256xf32>
    %30 = arith.mulf %29, %26 : vector<18x256xf32>
    %31 = arith.select %28, %26, %30 : vector<18x256xi1>, vector<18x256xf32>
    %c0_16 = arith.constant 0 : index
    %c0_17 = arith.constant 0 : index
    %32 = vector.load %arg7[%c0_16, %c0_17] : memref<18x9xf32, #tpu.memory_space<vmem>>, vector<18x9xf32>
    %c0_18 = arith.constant 0 : index
    %c0_19 = arith.constant 0 : index
    %33 = vector.load %arg6[%c0_18, %c0_19] : memref<9x256xf32, #tpu.memory_space<vmem>>, vector<9x256xf32>
    %cst_20 = arith.constant dense<0.000000e+00> : vector<18x256xf32>
    %34 = tpu.matmul %32, %33, %cst_20 {dimension_numbers = #tpu.dot_dimension_numbers<[1], [0], [0], [1], [0, 0, 1, 1], [], []>} : vector<18x9xf32>, vector<9x256xf32>, vector<18x256xf32> -> vector<18x256xf32>
    %c0_21 = arith.constant 0 : index
    %c0_22 = arith.constant 0 : index
    %35 = vector.load %arg8[%c0_21, %c0_22] : memref<2x18xf32, #tpu.memory_space<vmem>>, vector<2x18xf32>
    %36 = arith.mulf %31, %34 : vector<18x256xf32>
    %cst_23 = arith.constant dense<0.000000e+00> : vector<2x256xf32>
    %37 = tpu.matmul %35, %36, %cst_23 {dimension_numbers = #tpu.dot_dimension_numbers<[1], [0], [0], [1], [0, 0, 1, 1], [], []>} : vector<2x18xf32>, vector<18x256xf32>, vector<2x256xf32> -> vector<2x256xf32>
    %cst_24 = arith.constant dense<0.000000e+00> : vector<2xf32>
    %38 = vector.multi_reduction <add>, %37, %cst_24 [1] : vector<2x256xf32> to vector<2xf32>
    %39 = vector.shape_cast %38 : vector<2xf32> to vector<2x1xf32>
    %c0_25 = arith.constant 0 : index
    %c0_26 = arith.constant 0 : index
    %40 = vector.load %arg9[%c0_25, %c0_26] : memref<1x1xf32, #tpu.memory_space<vmem>>, vector<1x1xf32>
    %41 = vector.broadcast %40 : vector<1x1xf32> to vector<2x1xf32>
    %42 = arith.addf %39, %41 : vector<2x1xf32>
    %cst_27 = arith.constant 0.000000e+00 : f32
    %43 = vector.broadcast %cst_27 : f32 to vector<2x1xf32>
    %44 = arith.subf %43, %42 : vector<2x1xf32>
    %45 = math.exp %44 : vector<2x1xf32>
    %cst_28 = arith.constant 1.000000e+00 : f32
    %46 = vector.broadcast %cst_28 : f32 to vector<2x1xf32>
    %47 = arith.addf %46, %45 : vector<2x1xf32>
    %cst_29 = arith.constant 1.000000e+00 : f32
    %48 = vector.broadcast %cst_29 : f32 to vector<2x1xf32>
    %49 = arith.divf %48, %47 : vector<2x1xf32>
    %c0_30 = arith.constant 0 : index
    %c0_31 = arith.constant 0 : index
    %50 = vector.load %arg10[%c0_30, %c0_31] : memref<2x1xf32, #tpu.memory_space<vmem>>, vector<2x1xf32>
    tpu.vector_store %arg10[%c0_30, %c0_31], %49 {strides = array<i32>} : memref<2x1xf32, #tpu.memory_space<vmem>>, vector<2x1xf32>,
    return
  }
  func.func @transform_0(%arg0: i32) -> (i32, i32) {
    %c0_i32 = arith.constant 0 : i32
    %c0_i32_0 = arith.constant 0 : i32
    %c0_i32_1 = arith.constant 0 : i32
    return %c0_i32, %c0_i32_0 : i32, i32
  }
  func.func @transform_1(%arg0: i32) -> (i32, i32) {
    %c0_i32 = arith.constant 0 : i32
    %c0_i32_0 = arith.constant 0 : i32
    %c0_i32_1 = arith.constant 0 : i32
    return %c0_i32, %c0_i32_0 : i32, i32
  }
  func.func @transform_2(%arg0: i32) -> (i32, i32) {
    %c0_i32 = arith.constant 0 : i32
    %c0_i32_0 = arith.constant 0 : i32
    %c0_i32_1 = arith.constant 0 : i32
    return %c0_i32, %c0_i32_0 : i32, i32
  }
  func.func @transform_3(%arg0: i32) -> (i32, i32) {
    %c0_i32 = arith.constant 0 : i32
    %c0_i32_0 = arith.constant 0 : i32
    %c0_i32_1 = arith.constant 0 : i32
    return %c0_i32, %c0_i32_0 : i32, i32
  }
  func.func @transform_4(%arg0: i32) -> (i32, i32) {
    %c0_i32 = arith.constant 0 : i32
    %c0_i32_0 = arith.constant 0 : i32
    %c0_i32_1 = arith.constant 0 : i32
    return %c0_i32, %c0_i32_0 : i32, i32
  }
  func.func @transform_5(%arg0: i32) -> (i32, i32) {
    %c0_i32 = arith.constant 0 : i32
    %c0_i32_0 = arith.constant 0 : i32
    %c0_i32_1 = arith.constant 0 : i32
    return %c0_i32, %c0_i32_0 : i32, i32
  }
  func.func @transform_6(%arg0: i32) -> (i32, i32) {
    %c0_i32 = arith.constant 0 : i32
    %c0_i32_0 = arith.constant 0 : i32
    %c0_i32_1 = arith.constant 0 : i32
    return %c0_i32, %c0_i32_0 : i32, i32
  }
  func.func @transform_7(%arg0: i32) -> (i32, i32) {
    %c0_i32 = arith.constant 0 : i32
    %c0_i32_0 = arith.constant 0 : i32
    %c0_i32_1 = arith.constant 0 : i32
    return %c0_i32, %c0_i32_0 : i32, i32
  }
  func.func @transform_8(%arg0: i32) -> (i32, i32) {
    %c0_i32 = arith.constant 0 : i32
    %c0_i32_0 = arith.constant 0 : i32
    %c0_i32_1 = arith.constant 0 : i32
    return %c0_i32, %c0_i32_0 : i32, i32
  }
  func.func @transform_9(%arg0: i32) -> (i32, i32) {
    %c0_i32 = arith.constant 0 : i32
    %c0_i32_0 = arith.constant 0 : i32
    %c0_i32_1 = arith.constant 0 : i32
    return %c0_i32, %c0_i32_0 : i32, i32
  }
}

</mosaic_0001>

<bundles_post_ra>
// kernel: discriminator_forward.3
= control target key start
LH: loop header
LB: loop body
LE: loop exit
PB: predicated region body
PF: predicated region fallthrough
CT: control target
= control target key end

     0   :  { %s1051_s12 = smov 0   ;;  %s1244_s0 = inlined_call_operand.vmem [shape: bf16[480,27], index: 0, kind: input, shape index: {}]   ;;  %s1245_s1 = inlined_call_operand.vmem [shape: bf16[27,64], index: 1, kind: input, shape index: {}]   ;;  %s1246_s2 = inlined_call_operand.vmem [shape: f32[1,64], index: 2, kind: input, shape index: {}]   ;;  %s1247_s3 = inlined_call_operand.vmem [shape: bf16[480,64], index: 3, kind: output, shape index: {}]  }
   0x1 LB: > { %s805_s13 = sadd.s32 4294967295, %s1026_s12   ;;  %p809_p0 = scmp.ge.s32.totalorder %s1026_s12, 1  ;;  %s1026_s12 = sphi %s1051_s12, %s13_s12  }
   0x2   : > { %p138_p1 = scmp.lt.s32.totalorder %s1026_s12, 3 }
   0x4   : > { %p139_p2 = pnand %p809_p0, %p138_p1 }
   0x5   : > { %s162_s16 = smul.u32 (!%p139_p2), 30, %s805_s13 }
   0x6   : > { %142 = sbr.rel (%p139_p2) target bundleno = 284 (0x11c), region = 32 }
   0x7   : > { %p163_p3 = scmp.lt.s32.totalorder (!%p139_p2), %s162_s16, 59 }
   0xb   : > { %vm348_vm0 = vcmask 1044480   ;;  %v1028_v0 = vmov 0.0   ;;  %v1003_v1 = vld [vmem:[%s1245_s1 + $0x8] sm:$0x3f]   ;;  %vm349_vm1 = vcmask 1045504   ;;  %v1029_v2 = vmov 65535  }
   0xc   : > { %924 = vmatprep.subr.bf16.mxu0 %v1028_v0  ;;  %988 = vmatprep.subr.bf16.mxu1 %v1028_v0  ;;  %v350_v3 = vsel %vm348_vm0, 4294967295, %v1029_v2  ;;  %vm1030_vm2 = vmmov 0   ;;  %v1004_v6 = vld [vmem:[%s1245_s1] sm:$0xff]   ;;  %s1249_s16 = smov (!%p163_p3, %s162_s16), 59  ;;  %vm302_vm3 = vcmask 220160   ;;  %vm718_vm6 = vcmask 519168  }
   0xd   : > { %v351_v4 = vsel %vm349_vm1, %v350_v3, 0  ;;  %928 = vmatprep.mubr.msk.bf16.mxu0 %vm1030_vm2, %v1028_v0  ;;  %960 = vmatprep.mubr.msk.bf16.mxu1 %vm1030_vm2, %v1028_v0  ;;  %s810_s19 = sshll.u32 %s1249_s16, 2  ;;  %v1142_v22 = vld [vmem:[%s1246_s2] ss:$0 sm:$0xff] }
   0xe   : > { %v353_v5 = vand.u32 %v1003_v1, %v351_v4  ;;  %s1081_s22 = scalar_lea.vmem %s1244_s0, %s810_s19  ;;  %s1151_s27 = scalar_lea.vmem %s1247_s3, %s810_s19 }
   0xf   : > { %v1005_v7 = vld [vmem:[%s1081_s22] sm:$0xff]   ;;  %v1007_v9 = vld [vmem:[%s1081_s22 + $0x8] sm:$0xff]   ;;  %v1009_v11 = vld [vmem:[%s1081_s22 + $0x10] sm:$0xff]  }
  0x10   : > { %925 = vmatpush3.bf16.msra.mxu0 %v353_v5  ;;  %990 = vmatpush3.bf16.msra.mxu1 %v353_v5  ;;  %v1006_v8 = vld [vmem:[%s1081_s22 + $0x40] sm:$0xff]   ;;  %v1008_v10 = vld [vmem:[%s1081_s22 + $0x48] sm:$0xff]   ;;  %v1010_v12 = vld [vmem:[%s1081_s22 + $0x50] sm:$0xff]  }
  0x11   : > { %926 = vmatprep.subr.bf16.mxu0 %v1028_v0  ;;  %989 = vmatprep.subr.bf16.mxu1 %v1028_v0  ;;  %v1011_v13 = vld [vmem:[%s1081_s22 + $0x18] sm:$0xff]   ;;  %v1013_v15 = vld [vmem:[%s1081_s22 + $0x20] sm:$0xff]   ;;  %v1015_v17 = vld [vmem:[%s1081_s22 + $0x28] sm:$0xff]  }
  0x12   : > { %v1012_v14 = vld [vmem:[%s1081_s22 + $0x58] sm:$0xff]   ;;  %v1014_v16 = vld [vmem:[%s1081_s22 + $0x60] sm:$0xff]   ;;  %v1016_v18 = vld [vmem:[%s1081_s22 + $0x68] sm:$0xff]  }
  0x13   : > { %v1017_v19 = vld [vmem:[%s1081_s22 + $0x30] sm:$0xff]   ;;  %v1019_v21 = vld [vmem:[%s1081_s22 + $0x38] sm:$0xff]  }
  0x14   : > { %927 = vmatpush3.bf16.msra.mxu0 %v1004_v6  ;;  %991 = vmatpush3.bf16.msra.mxu1 %v1004_v6  ;;  %v1018_v20 = vld [vmem:[%s1081_s22 + $0x70] sm:$0xff]  }
  0x17   : > { %929 = vmatmul.mubr.msk.bf16.vlgmr.msra.gmra.mxu0 %vm302_vm3, %v1005_v7  ;;  %961 = vmatmul.mubr.msk.bf16.vlgmr.msra.gmra.mxu1 %vm302_vm3, %v1006_v8 }
  0x18   : > { %932 = vmatprep.mubr.msk.bf16.mxu0 %vm1030_vm2, %v1028_v0  ;;  %964 = vmatprep.mubr.msk.bf16.mxu1 %vm1030_vm2, %v1028_v0 }
  0x1f   : > { %933 = vmatmul.mubr.msk.bf16.gmra.mxu0 %vm302_vm3, %v1007_v9  ;;  %965 = vmatmul.mubr.msk.bf16.gmra.mxu1 %vm302_vm3, %v1008_v10 }
  0x20   : > { %936 = vmatprep.mubr.msk.bf16.mxu0 %vm1030_vm2, %v1028_v0  ;;  %968 = vmatprep.mubr.msk.bf16.mxu1 %vm1030_vm2, %v1028_v0 }
  0x27   : > { %937 = vmatmul.mubr.msk.bf16.gmra.mxu0 %vm302_vm3, %v1009_v11  ;;  %969 = vmatmul.mubr.msk.bf16.gmra.mxu1 %vm302_vm3, %v1010_v12 }
  0x28   : > { %940 = vmatprep.mubr.msk.bf16.mxu0 %vm1030_vm2, %v1028_v0  ;;  %972 = vmatprep.mubr.msk.bf16.mxu1 %vm1030_vm2, %v1028_v0 }
  0x2f   : > { %941 = vmatmul.mubr.msk.bf16.gmra.mxu0 %vm302_vm3, %v1011_v13  ;;  %973 = vmatmul.mubr.msk.bf16.gmra.mxu1 %vm302_vm3, %v1012_v14 }
  0x30   : > { %944 = vmatprep.mubr.msk.bf16.mxu0 %vm1030_vm2, %v1028_v0  ;;  %976 = vmatprep.mubr.msk.bf16.mxu1 %vm1030_vm2, %v1028_v0 }
  0x37   : > { %945 = vmatmul.mubr.msk.bf16.gmra.mxu0 %vm302_vm3, %v1013_v15  ;;  %977 = vmatmul.mubr.msk.bf16.gmra.mxu1 %vm302_vm3, %v1014_v16 }
  0x38   : > { %948 = vmatprep.mubr.msk.bf16.mxu0 %vm1030_vm2, %v1028_v0  ;;  %980 = vmatprep.mubr.msk.bf16.mxu1 %vm1030_vm2, %v1028_v0 }
  0x3f   : > { %949 = vmatmul.mubr.msk.bf16.gmra.mxu0 %vm302_vm3, %v1015_v17  ;;  %981 = vmatmul.mubr.msk.bf16.gmra.mxu1 %vm302_vm3, %v1016_v18 }
  0x40   : > { %952 = vmatprep.mubr.msk.bf16.mxu0 %vm1030_vm2, %v1028_v0  ;;  %984 = vmatprep.mubr.msk.bf16.mxu1 %vm1030_vm2, %v1028_v0 }
  0x47   : > { %953 = vmatmul.mubr.msk.bf16.gmra.mxu0 %vm302_vm3, %v1017_v19  ;;  %985 = vmatmul.mubr.msk.bf16.gmra.mxu1 %vm302_vm3, %v1018_v20 }
  0x48   : > { %956 = vmatprep.mubr.msk.bf16.mxu0 %vm1030_vm2, %v1028_v0 }
  0x4f   : > { %957 = vmatmul.mubr.msk.bf16.gmra.mxu0 %vm302_vm3, %v1019_v21 }
  0xd7   : > { %v389_v23 = vpop.f32.mrf.mxu0  ;;  %v453_v24 = vpop.f32.mrf.mxu1 }
  0xd8   : > { %v390_v25 = vadd.f32 %v1142_v22, %v389_v23  ;;  %v454_v26 = vadd.f32 %v1142_v22, %v453_v24 }
  0xd9   : > { %v930_v27 = vpop.f32.mrf.mxu0  ;;  %v962_v28 = vpop.f32.mrf.mxu1 }
  0xda   : > { %vm508_vm4 = vcmp.gt.f32.partialorder %v390_v25, 0.0  ;;  %v538_v29 = vmul.f32 0.01, %v390_v25  ;;  %vm524_vm5 = vcmp.gt.f32.partialorder %v454_v26, 0.0  ;;  %v554_v30 = vmul.f32 0.01, %v454_v26 }
  0xdb   : > { %v392_v31 = vpop.f32.mrf.mxu0  ;;  %v456_v32 = vpop.f32.mrf.mxu1 }
  0xdc   : > { %v568_v33 = vsel %vm508_vm4, %v390_v25, %v538_v29  ;;  %v584_v34 = vsel %vm524_vm5, %v454_v26, %v554_v30  ;;  %v393_v35 = vadd.f32 %v1142_v22, %v392_v31  ;;  %v457_v36 = vadd.f32 %v1142_v22, %v456_v32 }
  0xdd   : > { %v877_v37 = vpack.c.bf16 %v568_v33, %v568_v33  ;;  %v893_v38 = vpack.c.bf16 %v584_v34, %v584_v34  ;;  %v931_v39 = vpop.f32.mrf.mxu0  ;;  %v963_v40 = vpop.f32.mrf.mxu1 }
  0xde   : > { %vm509_vm7 = vcmp.gt.f32.partialorder %v393_v35, 0.0  ;;  %v539_v41 = vmul.f32 0.01, %v393_v35  ;;  %vm525_vm8 = vcmp.gt.f32.partialorder %v457_v36, 0.0  ;;  %v555_v42 = vmul.f32 0.01, %v457_v36 }
  0xdf   : > { %719 = vst.msk [vmem:[%s1151_s27] sm:$0xf] %vm718_vm6, %v877_v37  ;;  %735 = vst.msk [vmem:[%s1151_s27 + $0x40] sm:$0xf] %vm718_vm6, %v893_v38  ;;  %v397_v43 = vpop.f32.mrf.mxu0  ;;  %v461_v44 = vpop.f32.mrf.mxu1 }
  0xe0   : > { %v569_v45 = vsel %vm509_vm7, %v393_v35, %v539_v41  ;;  %v585_v46 = vsel %vm525_vm8, %v457_v36, %v555_v42  ;;  %v398_v47 = vadd.f32 %v1142_v22, %v397_v43  ;;  %v462_v48 = vadd.f32 %v1142_v22, %v461_v44 }
  0xe1   : > { %v878_v49 = vpack.c.bf16 %v569_v45, %v569_v45  ;;  %v894_v50 = vpack.c.bf16 %v585_v46, %v585_v46  ;;  %v934_v51 = vpop.f32.mrf.mxu0  ;;  %v966_v52 = vpop.f32.mrf.mxu1 }
  0xe2   : > { %vm510_vm9 = vcmp.gt.f32.partialorder %v398_v47, 0.0  ;;  %v540_v53 = vmul.f32 0.01, %v398_v47  ;;  %vm526_vm10 = vcmp.gt.f32.partialorder %v462_v48, 0.0  ;;  %v556_v54 = vmul.f32 0.01, %v462_v48 }
  0xe3   : > { %720 = vst.msk [vmem:[%s1151_s27 + $0x4] sm:$0xf] %vm718_vm6, %v878_v49  ;;  %736 = vst.msk [vmem:[%s1151_s27 + $0x44] sm:$0xf] %vm718_vm6, %v894_v50  ;;  %v400_v55 = vpop.f32.mrf.mxu0  ;;  %v464_v56 = vpop.f32.mrf.mxu1 }
  0xe4   : > { %v570_v57 = vsel %vm510_vm9, %v398_v47, %v540_v53  ;;  %v586_v58 = vsel %vm526_vm10, %v462_v48, %v556_v54  ;;  %v401_v59 = vadd.f32 %v1142_v22, %v400_v55  ;;  %v465_v60 = vadd.f32 %v1142_v22, %v464_v56 }
  0xe5   : > { %v879_v61 = vpack.c.bf16 %v570_v57, %v570_v57  ;;  %v895_v62 = vpack.c.bf16 %v586_v58, %v586_v58  ;;  %v935_v63 = vpop.f32.mrf.mxu0  ;;  %v967_v0 = vpop.f32.mrf.mxu1 }
  0xe6   : > { %vm511_vm11 = vcmp.gt.f32.partialorder %v401_v59, 0.0  ;;  %v541_v1 = vmul.f32 0.01, %v401_v59  ;;  %vm527_vm12 = vcmp.gt.f32.partialorder %v465_v60, 0.0  ;;  %v557_v2 = vmul.f32 0.01, %v465_v60 }
  0xe7   : > { %721 = vst.msk [vmem:[%s1151_s27 + $0x8] sm:$0xf] %vm718_vm6, %v879_v61  ;;  %737 = vst.msk [vmem:[%s1151_s27 + $0x48] sm:$0xf] %vm718_vm6, %v895_v62  ;;  %v405_v3 = vpop.f32.mrf.mxu0  ;;  %v469_v4 = vpop.f32.mrf.mxu1 }
  0xe8   : > { %v571_v5 = vsel %vm511_vm11, %v401_v59, %v541_v1  ;;  %v587_v6 = vsel %vm527_vm12, %v465_v60, %v557_v2  ;;  %v406_v7 = vadd.f32 %v1142_v22, %v405_v3  ;;  %v470_v8 = vadd.f32 %v1142_v22, %v469_v4 }
  0xe9   : > { %v880_v9 = vpack.c.bf16 %v571_v5, %v571_v5  ;;  %v896_v10 = vpack.c.bf16 %v587_v6, %v587_v6  ;;  %v938_v11 = vpop.f32.mrf.mxu0  ;;  %v970_v12 = vpop.f32.mrf.mxu1 }
  0xea   : > { %vm512_vm13 = vcmp.gt.f32.partialorder %v406_v7, 0.0  ;;  %v542_v13 = vmul.f32 0.01, %v406_v7  ;;  %vm528_vm14 = vcmp.gt.f32.partialorder %v470_v8, 0.0  ;;  %v558_v14 = vmul.f32 0.01, %v470_v8 }
  0xeb   : > { %722 = vst.msk [vmem:[%s1151_s27 + $0xc] sm:$0xf] %vm718_vm6, %v880_v9  ;;  %738 = vst.msk [vmem:[%s1151_s27 + $0x4c] sm:$0xf] %vm718_vm6, %v896_v10  ;;  %v408_v15 = vpop.f32.mrf.mxu0  ;;  %v472_v16 = vpop.f32.mrf.mxu1 }
  0xec   : > { %v572_v17 = vsel %vm512_vm13, %v406_v7, %v542_v13  ;;  %v588_v18 = vsel %vm528_vm14, %v470_v8, %v558_v14  ;;  %v409_v19 = vadd.f32 %v1142_v22, %v408_v15  ;;  %v473_v20 = vadd.f32 %v1142_v22, %v472_v16 }
  0xed   : > { %v881_v21 = vpack.c.bf16 %v572_v17, %v572_v17  ;;  %v897_v23 = vpack.c.bf16 %v588_v18, %v588_v18  ;;  %v939_v24 = vpop.f32.mrf.mxu0  ;;  %v971_v25 = vpop.f32.mrf.mxu1 }
  0xee   : > { %vm513_vm15 = vcmp.gt.f32.partialorder %v409_v19, 0.0  ;;  %v543_v26 = vmul.f32 0.01, %v409_v19  ;;  %vm529_vm0 = vcmp.gt.f32.partialorder %v473_v20, 0.0  ;;  %v559_v27 = vmul.f32 0.01, %v473_v20 }
  0xef   : > { %723 = vst.msk [vmem:[%s1151_s27 + $0x10] sm:$0xf] %vm718_vm6, %v881_v21  ;;  %739 = vst.msk [vmem:[%s1151_s27 + $0x50] sm:$0xf] %vm718_vm6, %v897_v23  ;;  %v413_v28 = vpop.f32.mrf.mxu0  ;;  %v477_v29 = vpop.f32.mrf.mxu1 }
  0xf0   : > { %v573_v30 = vsel %vm513_vm15, %v409_v19, %v543_v26  ;;  %v589_v31 = vsel %vm529_vm0, %v473_v20, %v559_v27  ;;  %v414_v32 = vadd.f32 %v1142_v22, %v413_v28  ;;  %v478_v33 = vadd.f32 %v1142_v22, %v477_v29 }
  0xf1   : > { %v882_v34 = vpack.c.bf16 %v573_v30, %v573_v30  ;;  %v898_v35 = vpack.c.bf16 %v589_v31, %v589_v31  ;;  %v942_v36 = vpop.f32.mrf.mxu0  ;;  %v974_v37 = vpop.f32.mrf.mxu1 }
  0xf2   : > { %vm514_vm1 = vcmp.gt.f32.partialorder %v414_v32, 0.0  ;;  %v544_v38 = vmul.f32 0.01, %v414_v32  ;;  %vm530_vm2 = vcmp.gt.f32.partialorder %v478_v33, 0.0  ;;  %v560_v39 = vmul.f32 0.01, %v478_v33 }
  0xf3   : > { %724 = vst.msk [vmem:[%s1151_s27 + $0x14] sm:$0xf] %vm718_vm6, %v882_v34  ;;  %740 = vst.msk [vmem:[%s1151_s27 + $0x54] sm:$0xf] %vm718_vm6, %v898_v35  ;;  %v416_v40 = vpop.f32.mrf.mxu0  ;;  %v480_v41 = vpop.f32.mrf.mxu1 }
  0xf4   : > { %v574_v42 = vsel %vm514_vm1, %v414_v32, %v544_v38  ;;  %v590_v43 = vsel %vm530_vm2, %v478_v33, %v560_v39  ;;  %v417_v44 = vadd.f32 %v1142_v22, %v416_v40  ;;  %v481_v45 = vadd.f32 %v1142_v22, %v480_v41 }
  0xf5   : > { %v883_v46 = vpack.c.bf16 %v574_v42, %v574_v42  ;;  %v899_v47 = vpack.c.bf16 %v590_v43, %v590_v43  ;;  %v943_v48 = vpop.f32.mrf.mxu0  ;;  %v975_v49 = vpop.f32.mrf.mxu1 }
  0xf6   : > { %vm515_vm3 = vcmp.gt.f32.partialorder %v417_v44, 0.0  ;;  %v545_v50 = vmul.f32 0.01, %v417_v44  ;;  %vm531_vm4 = vcmp.gt.f32.partialorder %v481_v45, 0.0  ;;  %v561_v51 = vmul.f32 0.01, %v481_v45 }
  0xf7   : > { %725 = vst.msk [vmem:[%s1151_s27 + $0x18] sm:$0xf] %vm718_vm6, %v883_v46  ;;  %741 = vst.msk [vmem:[%s1151_s27 + $0x58] sm:$0xf] %vm718_vm6, %v899_v47  ;;  %v421_v52 = vpop.f32.mrf.mxu0  ;;  %v485_v53 = vpop.f32.mrf.mxu1 }
  0xf8   : > { %v575_v54 = vsel %vm515_vm3, %v417_v44, %v545_v50  ;;  %v591_v55 = vsel %vm531_vm4, %v481_v45, %v561_v51  ;;  %v422_v56 = vadd.f32 %v1142_v22, %v421_v52  ;;  %v486_v57 = vadd.f32 %v1142_v22, %v485_v53 }
  0xf9   : > { %v884_v58 = vpack.c.bf16 %v575_v54, %v575_v54  ;;  %v900_v59 = vpack.c.bf16 %v591_v55, %v591_v55  ;;  %v946_v60 = vpop.f32.mrf.mxu0  ;;  %v978_v61 = vpop.f32.mrf.mxu1 }
  0xfa   : > { %vm516_vm5 = vcmp.gt.f32.partialorder %v422_v56, 0.0  ;;  %v546_v62 = vmul.f32 0.01, %v422_v56  ;;  %vm532_vm7 = vcmp.gt.f32.partialorder %v486_v57, 0.0  ;;  %v562_v63 = vmul.f32 0.01, %v486_v57 }
  0xfb   : > { %726 = vst.msk [vmem:[%s1151_s27 + $0x1c] sm:$0xf] %vm718_vm6, %v884_v58  ;;  %742 = vst.msk [vmem:[%s1151_s27 + $0x5c] sm:$0xf] %vm718_vm6, %v900_v59  ;;  %v424_v0 = vpop.f32.mrf.mxu0  ;;  %v488_v1 = vpop.f32.mrf.mxu1 }
  0xfc   : > { %v576_v2 = vsel %vm516_vm5, %v422_v56, %v546_v62  ;;  %v592_v3 = vsel %vm532_vm7, %v486_v57, %v562_v63  ;;  %v425_v4 = vadd.f32 %v1142_v22, %v424_v0  ;;  %v489_v5 = vadd.f32 %v1142_v22, %v488_v1 }
  0xfd   : > { %v885_v6 = vpack.c.bf16 %v576_v2, %v576_v2  ;;  %v901_v7 = vpack.c.bf16 %v592_v3, %v592_v3  ;;  %v947_v8 = vpop.f32.mrf.mxu0  ;;  %v979_v9 = vpop.f32.mrf.mxu1 }
  0xfe   : > { %vm517_vm8 = vcmp.gt.f32.partialorder %v425_v4, 0.0  ;;  %v547_v10 = vmul.f32 0.01, %v425_v4  ;;  %vm533_vm9 = vcmp.gt.f32.partialorder %v489_v5, 0.0  ;;  %v563_v11 = vmul.f32 0.01, %v489_v5 }
  0xff   : > { %727 = vst.msk [vmem:[%s1151_s27 + $0x20] sm:$0xf] %vm718_vm6, %v885_v6  ;;  %743 = vst.msk [vmem:[%s1151_s27 + $0x60] sm:$0xf] %vm718_vm6, %v901_v7  ;;  %v429_v12 = vpop.f32.mrf.mxu0  ;;  %v493_v13 = vpop.f32.mrf.mxu1 }
 0x100   : > { %v577_v14 = vsel %vm517_vm8, %v425_v4, %v547_v10  ;;  %v593_v15 = vsel %vm533_vm9, %v489_v5, %v563_v11  ;;  %v430_v16 = vadd.f32 %v1142_v22, %v429_v12  ;;  %v494_v17 = vadd.f32 %v1142_v22, %v493_v13 }
 0x101   : > { %v886_v18 = vpack.c.bf16 %v577_v14, %v577_v14  ;;  %v902_v19 = vpack.c.bf16 %v593_v15, %v593_v15  ;;  %v950_v20 = vpop.f32.mrf.mxu0  ;;  %v982_v21 = vpop.f32.mrf.mxu1 }
 0x102   : > { %vm518_vm10 = vcmp.gt.f32.partialorder %v430_v16, 0.0  ;;  %v548_v23 = vmul.f32 0.01, %v430_v16  ;;  %vm534_vm11 = vcmp.gt.f32.partialorder %v494_v17, 0.0  ;;  %v564_v24 = vmul.f32 0.01, %v494_v17 }
 0x103   : > { %728 = vst.msk [vmem:[%s1151_s27 + $0x24] sm:$0xf] %vm718_vm6, %v886_v18  ;;  %744 = vst.msk [vmem:[%s1151_s27 + $0x64] sm:$0xf] %vm718_vm6, %v902_v19  ;;  %v432_v25 = vpop.f32.mrf.mxu0  ;;  %v496_v26 = vpop.f32.mrf.mxu1 }
 0x104   : > { %v578_v27 = vsel %vm518_vm10, %v430_v16, %v548_v23  ;;  %v594_v28 = vsel %vm534_vm11, %v494_v17, %v564_v24  ;;  %v433_v29 = vadd.f32 %v1142_v22, %v432_v25  ;;  %v497_v30 = vadd.f32 %v1142_v22, %v496_v26 }
 0x105   : > { %v887_v31 = vpack.c.bf16 %v578_v27, %v578_v27  ;;  %v903_v32 = vpack.c.bf16 %v594_v28, %v594_v28  ;;  %v951_v33 = vpop.f32.mrf.mxu0  ;;  %v983_v34 = vpop.f32.mrf.mxu1 }
 0x106   : > { %vm519_vm12 = vcmp.gt.f32.partialorder %v433_v29, 0.0  ;;  %v549_v35 = vmul.f32 0.01, %v433_v29  ;;  %vm535_vm13 = vcmp.gt.f32.partialorder %v497_v30, 0.0  ;;  %v565_v36 = vmul.f32 0.01, %v497_v30 }
 0x107   : > { %729 = vst.msk [vmem:[%s1151_s27 + $0x28] sm:$0xf] %vm718_vm6, %v887_v31  ;;  %745 = vst.msk [vmem:[%s1151_s27 + $0x68] sm:$0xf] %vm718_vm6, %v903_v32  ;;  %v437_v37 = vpop.f32.mrf.mxu0  ;;  %v501_v38 = vpop.f32.mrf.mxu1 }
 0x108   : > { %v579_v39 = vsel %vm519_vm12, %v433_v29, %v549_v35  ;;  %v595_v40 = vsel %vm535_vm13, %v497_v30, %v565_v36  ;;  %v438_v41 = vadd.f32 %v1142_v22, %v437_v37  ;;  %v502_v42 = vadd.f32 %v1142_v22, %v501_v38 }
 0x109   : > { %v888_v43 = vpack.c.bf16 %v579_v39, %v579_v39  ;;  %v904_v44 = vpack.c.bf16 %v595_v40, %v595_v40  ;;  %v954_v45 = vpop.f32.mrf.mxu0  ;;  %v986_v46 = vpop.f32.mrf.mxu1 }
 0x10a   : > { %vm520_vm14 = vcmp.gt.f32.partialorder %v438_v41, 0.0  ;;  %v550_v47 = vmul.f32 0.01, %v438_v41  ;;  %vm536_vm15 = vcmp.gt.f32.partialorder %v502_v42, 0.0  ;;  %v566_v48 = vmul.f32 0.01, %v502_v42 }
 0x10b   : > { %730 = vst.msk [vmem:[%s1151_s27 + $0x2c] sm:$0xf] %vm718_vm6, %v888_v43  ;;  %746 = vst.msk [vmem:[%s1151_s27 + $0x6c] sm:$0xf] %vm718_vm6, %v904_v44  ;;  %v440_v49 = vpop.f32.mrf.mxu0  ;;  %v504_v50 = vpop.f32.mrf.mxu1 }
 0x10c   : > { %v580_v51 = vsel %vm520_vm14, %v438_v41, %v550_v47  ;;  %v596_v52 = vsel %vm536_vm15, %v502_v42, %v566_v48  ;;  %v441_v53 = vadd.f32 %v1142_v22, %v440_v49  ;;  %v505_v54 = vadd.f32 %v1142_v22, %v504_v50 }
 0x10d   : > { %v889_v55 = vpack.c.bf16 %v580_v51, %v580_v51  ;;  %v905_v56 = vpack.c.bf16 %v596_v52, %v596_v52  ;;  %v955_v57 = vpop.f32.mrf.mxu0  ;;  %v987_v58 = vpop.f32.mrf.mxu1 }
 0x10e   : > { %vm521_vm0 = vcmp.gt.f32.partialorder %v441_v53, 0.0  ;;  %v551_v59 = vmul.f32 0.01, %v441_v53  ;;  %vm537_vm1 = vcmp.gt.f32.partialorder %v505_v54, 0.0  ;;  %v567_v60 = vmul.f32 0.01, %v505_v54 }
 0x10f   : > { %731 = vst.msk [vmem:[%s1151_s27 + $0x30] sm:$0xf] %vm718_vm6, %v889_v55  ;;  %747 = vst.msk [vmem:[%s1151_s27 + $0x70] sm:$0xf] %vm718_vm6, %v905_v56  ;;  %v445_v61 = vpop.f32.mrf.mxu0 }
 0x110   : > { %v581_v62 = vsel %vm521_vm0, %v441_v53, %v551_v59  ;;  %v597_v63 = vsel %vm537_vm1, %v505_v54, %v567_v60  ;;  %v446_v0 = vadd.f32 %v1142_v22, %v445_v61 }
 0x111   : > { %v890_v1 = vpack.c.bf16 %v581_v62, %v581_v62  ;;  %v906_v2 = vpack.c.bf16 %v597_v63, %v597_v63  ;;  %v958_v3 = vpop.f32.mrf.mxu0 }
 0x112   : > { %vm522_vm2 = vcmp.gt.f32.partialorder %v446_v0, 0.0  ;;  %v552_v4 = vmul.f32 0.01, %v446_v0 }
 0x113   : > { %732 = vst.msk [vmem:[%s1151_s27 + $0x34] sm:$0xf] %vm718_vm6, %v890_v1  ;;  %748 = vst.msk [vmem:[%s1151_s27 + $0x74] sm:$0xf] %vm718_vm6, %v906_v2  ;;  %v448_v5 = vpop.f32.mrf.mxu0 }
 0x114   : > { %v582_v6 = vsel %vm522_vm2, %v446_v0, %v552_v4  ;;  %v449_v7 = vadd.f32 %v1142_v22, %v448_v5 }
 0x115   : > { %v891_v8 = vpack.c.bf16 %v582_v6, %v582_v6  ;;  %v959_v9 = vpop.f32.mrf.mxu0 }
 0x116   : > { %vm523_vm3 = vcmp.gt.f32.partialorder %v449_v7, 0.0  ;;  %v553_v10 = vmul.f32 0.01, %v449_v7 }
 0x117   : > { %733 = vst.msk [vmem:[%s1151_s27 + $0x38] sm:$0xf] %vm718_vm6, %v891_v8 }
 0x118   : > { %v583_v11 = vsel %vm523_vm3, %v449_v7, %v553_v10 }
 0x119   : > { %v892_v12 = vpack.c.bf16 %v583_v11, %v583_v11 }
 0x11b   : > { %734 = vst.msk [vmem:[%s1151_s27 + $0x3c] sm:$0xf] %vm718_vm6, %v892_v12 }
 0x11c PF: > { %s13_s12 = sadd.s32 1, %s1026_s12  }
 0x11d   : > { %p10_p4 = scmp.ge.s32.totalorder %s13_s12, 4  }
 0x11f   :  { %12 = sbr.rel (!%p10_p4) target bundleno = 1 (0x1), region = 62 }

// kernel: discriminator_forward.4
= control target key start
LH: loop header
LB: loop body
LE: loop exit
PB: predicated region body
PF: predicated region fallthrough
CT: control target
= control target key end

     0   :  { %v1427_v34 = vmov 0.0   ;;  %vm1428_vm0 = vmmov 0   ;;  %vm522_vm1 = vcmask 523264   ;;  %vm819_vm2 = vcmask 1041408   ;;  %s1835_s1 = inlined_call_operand.vmem [shape: bf16[576,128], index: 1, kind: input, shape index: {}]   ;;  %s1836_s0 = inlined_call_operand.vmem [shape: bf16[98,576], index: 0, kind: input, shape index: {}]   ;;  %s1837_s2 = inlined_call_operand.vmem [shape: f32[1,128], index: 2, kind: input, shape index: {}]   ;;  %s1838_s3 = inlined_call_operand.vmem [shape: f32[1,128], index: 3, kind: input, shape index: {}]   ;;  %s1839_s4 = inlined_call_operand.vmem [shape: f32[1,128], index: 4, kind: input, shape index: {}]   ;;  %s1840_s5 = inlined_call_operand.vmem [shape: bf16[98,128], index: 5, kind: output, shape index: {}]  }
   0x1   :  { %v1342_v0 = vld [vmem:[%s1835_s1 + $0x78] sm:$0xff]   ;;  %v1346_v4 = vld [vmem:[%s1835_s1 + $0x70] sm:$0xff]   ;;  %v1350_v8 = vld [vmem:[%s1835_s1 + $0x68] sm:$0xff]  }
   0x2   :  { %v1343_v1 = vld [vmem:[%s1835_s1 + $0xf8] sm:$0xff]   ;;  %1169 = vmatprep.subr.bf16.mxu0 %v1342_v0  ;;  %v1347_v5 = vld [vmem:[%s1835_s1 + $0xf0] sm:$0xff]   ;;  %v1351_v9 = vld [vmem:[%s1835_s1 + $0xe8] sm:$0xff]  }
   0x3   :  { %v1344_v2 = vld [vmem:[%s1835_s1 + $0x38] sm:$0xff]   ;;  %1227 = vmatprep.subr.bf16.mxu1 %v1343_v1  ;;  %v1348_v6 = vld [vmem:[%s1835_s1 + $0x30] sm:$0xff]   ;;  %v1352_v10 = vld [vmem:[%s1835_s1 + $0x28] sm:$0xff]  }
   0x4   :  { %v1345_v3 = vld [vmem:[%s1835_s1 + $0xb8] sm:$0xff]   ;;  %1170 = vmatpush3.bf16.msra.mxu0 %v1344_v2  ;;  %v1349_v7 = vld [vmem:[%s1835_s1 + $0xb0] sm:$0xff]   ;;  %v1353_v11 = vld [vmem:[%s1835_s1 + $0xa8] sm:$0xff]  }
   0x5   :  { %1228 = vmatpush3.bf16.msra.mxu1 %v1345_v3  ;;  %1171 = vmatprep.subr.bf16.mxu0 %v1346_v4  ;;  %v1354_v12 = vld [vmem:[%s1835_s1 + $0x60] sm:$0xff]   ;;  %v1358_v16 = vld [vmem:[%s1835_s1 + $0x58] sm:$0xff]   ;;  %v1362_v20 = vld [vmem:[%s1835_s1 + $0x50] sm:$0xff]  }
   0x6   :  { %1229 = vmatprep.subr.bf16.mxu1 %v1347_v5  ;;  %v1355_v13 = vld [vmem:[%s1835_s1 + $0xe0] sm:$0xff]   ;;  %v1359_v17 = vld [vmem:[%s1835_s1 + $0xd8] sm:$0xff]   ;;  %v1363_v21 = vld [vmem:[%s1835_s1 + $0xd0] sm:$0xff]  }
   0x7   :  { %v1356_v14 = vld [vmem:[%s1835_s1 + $0x20] sm:$0xff]   ;;  %v1360_v18 = vld [vmem:[%s1835_s1 + $0x18] sm:$0xff]   ;;  %v1364_v22 = vld [vmem:[%s1835_s1 + $0x10] sm:$0xff]  }
   0x8   :  { %1172 = vmatpush3.bf16.msra.mxu0 %v1348_v6  ;;  %v1357_v15 = vld [vmem:[%s1835_s1 + $0xa0] sm:$0xff]   ;;  %v1361_v19 = vld [vmem:[%s1835_s1 + $0x98] sm:$0xff]   ;;  %v1365_v23 = vld [vmem:[%s1835_s1 + $0x90] sm:$0xff]  }
   0x9   :  { %1230 = vmatpush3.bf16.msra.mxu1 %v1349_v7  ;;  %1173 = vmatprep.subr.bf16.mxu0 %v1350_v8  ;;  %v1366_v24 = vld [vmem:[%s1835_s1 + $0x48] sm:$0xff]   ;;  %v1370_v28 = vld [vmem:[%s1835_s1 + $0x40] sm:$0xff]   ;;  %v1380_v37 = vld [vmem:[%s1835_s1 + $0x118] sm:$0xff]  }
   0xa   :  { %1231 = vmatprep.subr.bf16.mxu1 %v1351_v9  ;;  %v1367_v25 = vld [vmem:[%s1835_s1 + $0xc8] sm:$0xff]   ;;  %v1371_v29 = vld [vmem:[%s1835_s1 + $0xc0] sm:$0xff]   ;;  %v1391_v43 = vld [vmem:[%s1835_s1 + $0x110] sm:$0xff]  }
   0xb   :  { %v1368_v26 = vld [vmem:[%s1835_s1 + $0x8] sm:$0xff]   ;;  %v1372_v30 = vld [vmem:[%s1835_s1] sm:$0xff]   ;;  %v1389_v44 = vld [vmem:[%s1836_s0 + $0x5c] ss:$20 sps:$4 sm:$0xff]  }
   0xc   :  { %1174 = vmatpush3.bf16.msra.mxu0 %v1352_v10  ;;  %v1369_v27 = vld [vmem:[%s1835_s1 + $0x88] sm:$0xff]   ;;  %v1373_v31 = vld [vmem:[%s1835_s1 + $0x80] sm:$0xff]   ;;  %v1394_v48 = vld [vmem:[%s1836_s0 + $0x7c] ss:$20 sps:$4 sm:$0xff]  }
   0xd   :  { %1232 = vmatpush3.bf16.msra.mxu1 %v1353_v11  ;;  %1175 = vmatprep.subr.bf16.mxu0 %v1354_v12  ;;  %v1374_v32 = vld [vmem:[%s1836_s0] ss:$20 sps:$4 sm:$0xff]   ;;  %v1376_v33 = vld [vmem:[%s1836_s0 + $0x4] ss:$20 sps:$4 sm:$0xff]   ;;  %v1377_v35 = vld [vmem:[%s1836_s0 + $0x8] ss:$20 sps:$4 sm:$0xff]  }
   0xe   :  { %1233 = vmatprep.subr.bf16.mxu1 %v1355_v13  ;;  %v1379_v36 = vld [vmem:[%s1836_s0 + $0xc] ss:$20 sps:$4 sm:$0xff]   ;;  %576 = vmatprep.mubr.bf16.mxu0 %v1376_v33  ;;  %v1383_v39 = vld [vmem:[%s1836_s0 + $0x34] ss:$20 sps:$4 sm:$0xff]   ;;  %v1386_v41 = vld [vmem:[%s1836_s0 + $0x30] ss:$20 sps:$4 sm:$0xff]  }
   0xf   :  { %664 = vmatprep.mubr.bf16.mxu1 %v1379_v36  ;;  %v1381_v38 = vld [vmem:[%s1836_s0 + $0x2c] ss:$20 sps:$4 sm:$0xff]   ;;  %v1385_v40 = vld [vmem:[%s1836_s0 + $0x28] ss:$20 sps:$4 sm:$0xff]   ;;  %v1392_v46 = vld [vmem:[%s1836_s0 + $0x50] ss:$20 sps:$4 sm:$0xff]  }
  0x10   :  { %1176 = vmatpush3.bf16.msra.mxu0 %v1356_v14  ;;  %v1387_v42 = vld [vmem:[%s1836_s0 + $0x54] ss:$20 sps:$4 sm:$0xff]   ;;  %v1393_v47 = vld [vmem:[%s1836_s0 + $0x58] ss:$20 sps:$4 sm:$0xff]   ;;  %v1413_v50 = vld [vmem:[%s1835_s1 + $0x100] sm:$0xff]  }
  0x11   :  { %1234 = vmatpush3.bf16.msra.mxu1 %v1357_v15  ;;  %1177 = vmatprep.subr.bf16.mxu0 %v1358_v16  ;;  %v1400_v45 = vld [vmem:[%s1835_s1 + $0x108] sm:$0xff]   ;;  %v1396_v49 = vld [vmem:[%s1836_s0 + $0x84] ss:$20 sps:$4 sm:$0xff]   ;;  %v1399_v52 = vld [vmem:[%s1836_s0 + $0x80] ss:$20 sps:$4 sm:$0xff]  }
  0x12   :  { %1235 = vmatprep.subr.bf16.mxu1 %v1359_v17  ;;  %v1398_v51 = vld [vmem:[%s1836_s0 + $0x78] ss:$20 sps:$4 sm:$0xff]   ;;  %v1405_v55 = vld [vmem:[%s1836_s0 + $0xa0] ss:$20 sps:$4 sm:$0xff]   ;;  %v1406_v56 = vld [vmem:[%s1836_s0 + $0xa8] ss:$20 sps:$4 sm:$0xff]  }
  0x13   :  { %v1401_v53 = vld [vmem:[%s1836_s0 + $0xa4] ss:$20 sps:$4 sm:$0xff]   ;;  %v1403_v54 = vld [vmem:[%s1836_s0 + $0xac] ss:$20 sps:$4 sm:$0xff]   ;;  %v1409_v58 = vld [vmem:[%s1836_s0 + $0xd4] ss:$20 sps:$4 sm:$0xff]  }
  0x14   :  { %1178 = vmatpush3.bf16.msra.mxu0 %v1360_v18  ;;  %v1407_v57 = vld [vmem:[%s1836_s0 + $0xcc] ss:$20 sps:$4 sm:$0xff]   ;;  %v57_v59 = vld [vmem:[%s1836_s0 + $0xf0] sm:$0x11]  ;;  %v58_v60 = vld [vmem:[%s1836_s0 + $0xf8] sm:$0x11] }
  0x15   :  { %1236 = vmatpush3.bf16.msra.mxu1 %v1361_v19  ;;  %1179 = vmatprep.subr.bf16.mxu0 %v1362_v20  ;;  %v1411_v61 = vld [vmem:[%s1836_s0 + $0xc8] ss:$20 sps:$4 sm:$0xff]   ;;  %v1412_v62 = vld [vmem:[%s1836_s0 + $0xd0] ss:$20 sps:$4 sm:$0xff]   ;;  %v1060_v63 = vcombine.high %v57_v59, %v57_v59  ;;  %v1062_v0 = vcombine.high %v58_v60, %v58_v60  ;;  %v1059_v1 = vcombine.low %v57_v59, %v57_v59  ;;  %v1420_v5 = vld [vmem:[%s1836_s0 + $0x38] ss:$20 sps:$4 sm:$0xff]  }
  0x16   :  { %1237 = vmatprep.subr.bf16.mxu1 %v1363_v21  ;;  %v1061_v2 = vcombine.low %v58_v60, %v58_v60  ;;  %v1418_v3 = vld [vmem:[%s1836_s0 + $0x10] ss:$20 sps:$4 sm:$0xff]   ;;  %v1421_v6 = vld [vmem:[%s1836_s0 + $0xd8] ss:$20 sps:$4 sm:$0xff]   ;;  %v1422_v7 = vld [vmem:[%s1836_s0 + $0x60] ss:$20 sps:$4 sm:$0xff]  }
  0x17   :  { %v1419_v4 = vld [vmem:[%s1836_s0 + $0xb0] ss:$20 sps:$4 sm:$0xff]   ;;  %v1423_v8 = vld [vmem:[%s1836_s0 + $0x100] ss:$0 sps:$4 sm:$0x11]  }
  0x18   :  { %1180 = vmatpush3.bf16.msra.mxu0 %v1364_v22  ;;  %v1424_v9 = vld [vmem:[%s1836_s0 + $0x88] ss:$20 sps:$4 sm:$0xff]   ;;  %v1698_v12 = vld [vmem:[%s1837_s2] ss:$0 sm:$0xff] }
  0x19   :  { %1238 = vmatpush3.bf16.msra.mxu1 %v1365_v23  ;;  %1181 = vmatprep.subr.bf16.mxu0 %v1366_v24 }
  0x1a   :  { %1239 = vmatprep.subr.bf16.mxu1 %v1367_v25 }
  0x1c   :  { %1182 = vmatpush3.bf16.msra.mxu0 %v1368_v26 }
  0x1d   :  { %1240 = vmatpush3.bf16.msra.mxu1 %v1369_v27  ;;  %1183 = vmatprep.subr.bf16.mxu0 %v1370_v28 }
  0x1e   :  { %1241 = vmatprep.subr.bf16.mxu1 %v1371_v29 }
  0x20   :  { %1184 = vmatpush3.bf16.msra.mxu0 %v1372_v30 }
  0x21   :  { %1242 = vmatpush3.bf16.msra.mxu1 %v1373_v31  ;;  %1296 = vmatprep.subr.bf16.mxu0 %v1427_v34 }
  0x22   :  { %1332 = vmatprep.subr.bf16.mxu1 %v1427_v34 }
  0x23   :  { %577 = vmatmul.mubr.bf16.vlgmr.msra.gmra.mxu0 %v1374_v32 }
  0x24   :  { %665 = vmatmul.mubr.bf16.vlgmr.msra.gmra.mxu1 %v1377_v35  ;;  %1297 = vmatpush3.bf16.msra.mxu0 %v1380_v37 }
  0x25   :  { %584 = vmatprep.mubr.bf16.mxu0 %v1381_v38  ;;  %1298 = vmatprep.subr.bf16.mxu0 %v1427_v34 }
  0x26   :  { %672 = vmatprep.mubr.bf16.mxu1 %v1383_v39  ;;  %1336 = vmatpush3.bf16.msra.mxu1 %v1380_v37 }
  0x27   :  { %1333 = vmatprep.subr.bf16.mxu1 %v1427_v34 }
  0x28   :  { %1299 = vmatpush3.bf16.msra.mxu0 %v1391_v43 }
  0x29   :  { %1300 = vmatprep.subr.bf16.mxu0 %v1427_v34 }
  0x2a   :  { %1337 = vmatpush3.bf16.msra.mxu1 %v1391_v43 }
  0x2b   :  { %585 = vmatmul.mubr.bf16.gmra.mxu0 %v1385_v40  ;;  %1334 = vmatprep.subr.bf16.mxu1 %v1427_v34 }
  0x2c   :  { %673 = vmatmul.mubr.bf16.gmra.mxu1 %v1386_v41  ;;  %592 = vmatprep.mubr.bf16.mxu0 %v1387_v42 }
  0x2d   :  { %680 = vmatprep.mubr.bf16.mxu1 %v1389_v44  ;;  %1301 = vmatpush3.bf16.msra.mxu0 %v1400_v45 }
  0x2e   :  { %1338 = vmatpush3.bf16.msra.mxu1 %v1400_v45  ;;  %1302 = vmatprep.subr.bf16.mxu0 %v1427_v34 }
  0x2f   :  { %1335 = vmatprep.subr.bf16.mxu1 %v1427_v34 }
  0x31   :  { %1303 = vmatpush3.bf16.msra.mxu0 %v1413_v50 }
  0x32   :  { %1339 = vmatpush3.bf16.msra.mxu1 %v1413_v50 }
  0x33   :  { %593 = vmatmul.mubr.bf16.gmra.mxu0 %v1392_v46 }
  0x34   :  { %681 = vmatmul.mubr.bf16.gmra.mxu1 %v1393_v47  ;;  %600 = vmatprep.mubr.bf16.mxu0 %v1394_v48 }
  0x35   :  { %688 = vmatprep.mubr.bf16.mxu1 %v1396_v49 }
  0x3b   :  { %601 = vmatmul.mubr.bf16.gmra.mxu0 %v1398_v51 }
  0x3c   :  { %689 = vmatmul.mubr.bf16.gmra.mxu1 %v1399_v52  ;;  %608 = vmatprep.mubr.bf16.mxu0 %v1401_v53 }
  0x3d   :  { %696 = vmatprep.mubr.bf16.mxu1 %v1403_v54 }
  0x43   :  { %609 = vmatmul.mubr.bf16.gmra.mxu0 %v1405_v55 }
  0x44   :  { %697 = vmatmul.mubr.bf16.gmra.mxu1 %v1406_v56  ;;  %616 = vmatprep.mubr.bf16.mxu0 %v1407_v57 }
  0x45   :  { %704 = vmatprep.mubr.bf16.mxu1 %v1409_v58 }
  0x4b   :  { %617 = vmatmul.mubr.bf16.gmra.mxu0 %v1411_v61 }
  0x4c   :  { %705 = vmatmul.mubr.bf16.gmra.mxu1 %v1412_v62  ;;  %624 = vmatprep.mubr.bf16.mxu0 %v1060_v63 }
  0x4d   :  { %712 = vmatprep.mubr.bf16.mxu1 %v1062_v0 }
  0x53   :  { %625 = vmatmul.mubr.bf16.gmra.mxu0 %v1059_v1 }
  0x54   :  { %713 = vmatmul.mubr.bf16.gmra.mxu1 %v1061_v2  ;;  %1304 = vmatprep.mubr.msk.bf16.mxu0 %vm1428_vm0, %v1427_v34 }
  0x55   :  { %1320 = vmatprep.mubr.msk.bf16.mxu1 %vm1428_vm0, %v1427_v34 }
  0x5b   :  { %1305 = vmatmul.mubr.msk.bf16.vlgmr.msra.gmra.mxu0 %vm522_vm1, %v1418_v3 }
  0x5c   :  { %1321 = vmatmul.mubr.msk.bf16.vlgmr.msra.gmra.mxu1 %vm522_vm1, %v1419_v4  ;;  %1308 = vmatprep.mubr.msk.bf16.mxu0 %vm1428_vm0, %v1427_v34 }
  0x5d   :  { %1324 = vmatprep.mubr.msk.bf16.mxu1 %vm1428_vm0, %v1427_v34 }
  0x63   :  { %1309 = vmatmul.mubr.msk.bf16.gmra.mxu0 %vm522_vm1, %v1420_v5 }
  0x64   :  { %1325 = vmatmul.mubr.msk.bf16.gmra.mxu1 %vm522_vm1, %v1421_v6  ;;  %1312 = vmatprep.mubr.msk.bf16.mxu0 %vm1428_vm0, %v1427_v34 }
  0x65   :  { %1328 = vmatprep.mubr.msk.bf16.mxu1 %vm1428_vm0, %v1427_v34 }
  0x6b   :  { %1313 = vmatmul.mubr.msk.bf16.gmra.mxu0 %vm522_vm1, %v1422_v7 }
  0x6c   :  { %1329 = vmatmul.mubr.msk.bf16.gmra.mxu1 %vm522_vm1, %v1423_v8  ;;  %1316 = vmatprep.mubr.msk.bf16.mxu0 %vm1428_vm0, %v1427_v34 }
  0x73   :  { %1317 = vmatmul.mubr.msk.bf16.gmra.mxu0 %vm522_vm1, %v1424_v9 }
  0xe3   :  { %v1185_v10 = vpop.f32.mrf.mxu0 }
  0xe4   :  { %v1243_v11 = vpop.f32.mrf.mxu1 }
  0xe5   :  { %v1186_v13 = vpop.f32.mrf.mxu0 }
  0xe6   :  { %v1187_v14 = vadd.f32 %v1186_v13, %v1185_v10  ;;  %v1244_v15 = vpop.f32.mrf.mxu1 }
  0xe7   :  { %v1245_v16 = vadd.f32 %v1244_v15, %v1243_v11  ;;  %v1188_v17 = vpop.f32.mrf.mxu0 }
  0xe8   :  { %v579_v18 = vadd.f32 %v1187_v14, %v1698_v12  ;;  %v1246_v19 = vpop.f32.mrf.mxu1 }
  0xe9   :  { %v1189_v20 = vpop.f32.mrf.mxu0 }
  0xea   :  { %v1190_v21 = vadd.f32 %v1189_v20, %v1188_v17  ;;  %v1247_v22 = vpop.f32.mrf.mxu1  ;;  %v1701_v23 = vadd.f32 %v1245_v16, %v579_v18 }
  0xeb   :  { %v1248_v24 = vadd.f32 %v1247_v22, %v1246_v19  ;;  %v1191_v25 = vpop.f32.mrf.mxu0 }
  0xec   :  { %v582_v26 = vadd.f32 %v1190_v21, %v1698_v12  ;;  %v1249_v27 = vpop.f32.mrf.mxu1 }
  0xed   :  { %v1192_v28 = vpop.f32.mrf.mxu0 }
  0xee   :  { %v1193_v29 = vadd.f32 %v1192_v28, %v1191_v25  ;;  %v1250_v30 = vpop.f32.mrf.mxu1  ;;  %v1704_v31 = vadd.f32 %v1248_v24, %v582_v26 }
  0xef   :  { %v1251_v32 = vadd.f32 %v1250_v30, %v1249_v27  ;;  %v1194_v33 = vpop.f32.mrf.mxu0 }
  0xf0   :  { %v587_v34 = vadd.f32 %v1193_v29, %v1698_v12  ;;  %v1252_v35 = vpop.f32.mrf.mxu1 }
  0xf1   :  { %v1195_v36 = vpop.f32.mrf.mxu0 }
  0xf2   :  { %v1196_v37 = vadd.f32 %v1195_v36, %v1194_v33  ;;  %v1253_v38 = vpop.f32.mrf.mxu1  ;;  %v1707_v39 = vadd.f32 %v1251_v32, %v587_v34 }
  0xf3   :  { %v1254_v40 = vadd.f32 %v1253_v38, %v1252_v35  ;;  %v1197_v41 = vpop.f32.mrf.mxu0 }
  0xf4   :  { %v590_v42 = vadd.f32 %v1196_v37, %v1698_v12  ;;  %v1255_v43 = vpop.f32.mrf.mxu1 }
  0xf5   :  { %v1198_v44 = vpop.f32.mrf.mxu0 }
  0xf6   :  { %v1199_v45 = vadd.f32 %v1198_v44, %v1197_v41  ;;  %v1256_v46 = vpop.f32.mrf.mxu1  ;;  %v678_v47 = vadd.f32 %v1254_v40, %v590_v42 }
  0xf7   :  { %v1257_v48 = vadd.f32 %v1256_v46, %v1255_v43  ;;  %v1200_v49 = vpop.f32.mrf.mxu0 }
  0xf8   :  { %v595_v50 = vadd.f32 %v1199_v45, %v1698_v12  ;;  %v1258_v51 = vpop.f32.mrf.mxu1 }
  0xf9   :  { %v1201_v52 = vpop.f32.mrf.mxu0 }
  0xfa   :  { %v1202_v53 = vadd.f32 %v1201_v52, %v1200_v49  ;;  %v1259_v54 = vpop.f32.mrf.mxu1  ;;  %v683_v55 = vadd.f32 %v1257_v48, %v595_v50 }
  0xfb   :  { %v1260_v56 = vadd.f32 %v1259_v54, %v1258_v51  ;;  %v1203_v57 = vpop.f32.mrf.mxu0 }
  0xfc   :  { %v598_v58 = vadd.f32 %v1202_v53, %v1698_v12  ;;  %v1261_v59 = vpop.f32.mrf.mxu1 }
  0xfd   :  { %v1204_v60 = vpop.f32.mrf.mxu0 }
  0xfe   :  { %v1262_v61 = vpop.f32.mrf.mxu1  ;;  %v1712_v62 = vadd.f32 %v1260_v56, %v598_v58  ;;  %v1205_v51 = vadd.f32 %v1204_v60, %v1203_v57 }
  0xff   :  { %v1206_v63 = vpop.f32.mrf.mxu0 }
 0x100   :  { %v1714_v0 = vpop.f32.mrf.mxu1 }
 0x101   :  { %v1207_v1 = vpop.f32.mrf.mxu0 }
 0x102   :  { %v1716_v2 = vpop.f32.mrf.mxu1 }
 0x103   :  { %v1209_v3 = vpop.f32.mrf.mxu0 }
 0x104   :  { %v1718_v4 = vpop.f32.mrf.mxu1 }
 0x105   :  { %v1210_v5 = vpop.f32.mrf.mxu0 }
 0x106   :  { %v1720_v6 = vpop.f32.mrf.mxu1 }
 0x107   :  { %v1212_v7 = vpop.f32.mrf.mxu0 }
 0x108   :  { %v1722_v8 = vpop.f32.mrf.mxu1 }
 0x109   :  { %v1213_v9 = vpop.f32.mrf.mxu0 }
 0x10a   :  { %v1724_v10 = vpop.f32.mrf.mxu1  ;;  %v1214_v60 = vadd.f32 %v1213_v9, %v1212_v7 }
 0x10b   :  { %v1726_v11 = vpop.f32.mrf.mxu0 }
 0x10c   :  { %v1728_v13 = vpop.f32.mrf.mxu1 }
 0x10d   :  { %v1216_v14 = vpop.f32.mrf.mxu0 }
 0x10e   :  { %v1730_v15 = vpop.f32.mrf.mxu1 }
 0x10f   :  { %v1732_v16 = vpop.f32.mrf.mxu0 }
 0x110   :  { %v1734_v17 = vpop.f32.mrf.mxu1 }
 0x111   :  { %v1736_v18 = vpop.f32.mrf.mxu0 }
 0x112   :  { %v1738_v19 = vpop.f32.mrf.mxu1 }
 0x113   :  { %v1221_v20 = vpop.f32.mrf.mxu0 }
 0x114   :  { %v1740_v21 = vpop.f32.mrf.mxu1 }
 0x115   :  { %v1222_v22 = vpop.f32.mrf.mxu0 }
 0x116   :  { %v1742_v24 = vpop.f32.mrf.mxu1  ;;  %v1223_v7 = vadd.f32 %v1222_v22, %v1221_v20 }
 0x117   :  { %v1224_v25 = vpop.f32.mrf.mxu0 }
 0x118   :  { %v1282_v26 = vpop.f32.mrf.mxu1  ;;  %v603_v25 = vadd.f32 %v1205_v51, %v1698_v12 }
 0x119   :  { %v1225_v27 = vpop.f32.mrf.mxu0  ;;  %v1263_v26 = vadd.f32 %v1262_v61, %v1261_v59 }
 0x11a   :  { %v1283_v28 = vpop.f32.mrf.mxu1  ;;  %v1208_v27 = vadd.f32 %v1207_v1, %v1206_v63  ;;  %v1269_v63 = vadd.f32 %v1720_v6, %v1718_v4  ;;  %v1217_v1 = vadd.f32 %v1216_v14, %v1726_v11  ;;  %v1275_v4 = vadd.f32 %v1730_v15, %v1728_v13 }
 0x11b   :  { %v754_v29 = vpop.f32.mrf.mxu0  ;;  %v627_v14 = vadd.f32 %v1223_v7, %v1698_v12 }
 0x11c   :  { %v1744_v30 = vpop.f32.mrf.mxu1  ;;  %v1747_v35 = vadd.f32 %v754_v29, %v1701_v23 }
 0x11d   :  { %v1306_v32 = vpop.f32.mrf.mxu0 }
 0x11e   :  { %v1322_v33 = vpop.f32.mrf.mxu1  ;;  %v1211_v32 = vadd.f32 %v1210_v5, %v1209_v3  ;;  %v614_v3 = vadd.f32 %v1214_v60, %v1698_v12  ;;  %v1272_v5 = vadd.f32 %v1724_v10, %v1722_v8  ;;  %v1281_v8 = vadd.f32 %v1742_v24, %v1740_v21 }
 0x11f   :  { %v757_v34 = vpop.f32.mrf.mxu0 }
 0x120   :  { %v1750_v36 = vadd.f32 %v757_v34, %v1704_v31  ;;  %v789_v37 = vpop.f32.mrf.mxu1  ;;  %v611_v61 = vadd.f32 %v1211_v32, %v1698_v12  ;;  %v702_v10 = vadd.f32 %v1272_v5, %v614_v3  ;;  %v715_v15 = vadd.f32 %v1281_v8, %v627_v14 }
 0x121   :  { %v1307_v38 = vpop.f32.mrf.mxu0 }
 0x122   :  { %v808_v40 = vadd.f32 %v1750_v36, %v1747_v35  ;;  %v1323_v41 = vpop.f32.mrf.mxu1  ;;  %v606_v38 = vadd.f32 %v1208_v27, %v1698_v12  ;;  %v699_v6 = vadd.f32 %v1269_v63, %v611_v61 }
 0x123   :  { %v762_v42 = vpop.f32.mrf.mxu0  ;;  %v691_v41 = vadd.f32 %v1263_v26, %v603_v25 }
 0x124   :  { %v1755_v43 = vadd.f32 %v762_v42, %v1707_v39  ;;  %v794_v44 = vpop.f32.mrf.mxu1 }
 0x125   :  { %v1310_v45 = vpop.f32.mrf.mxu0 }
 0x126   :  { %v809_v46 = vadd.f32 %v808_v40, %v1755_v43  ;;  %v1326_v48 = vpop.f32.mrf.mxu1 }
 0x127   :  { %v765_v23 = vpop.f32.mrf.mxu0  ;;  %v619_v48 = vadd.f32 %v1217_v1, %v1698_v12 }
 0x128   :  { %v1758_v49 = vadd.f32 %v765_v23, %v678_v47  ;;  %v797_v31 = vpop.f32.mrf.mxu1 }
 0x129   :  { %v1311_v50 = vpop.f32.mrf.mxu0  ;;  %v707_v51 = vadd.f32 %v1275_v4, %v619_v48 }
 0x12a   :  { %v810_v52 = vadd.f32 %v809_v46, %v1758_v49  ;;  %v1327_v53 = vpop.f32.mrf.mxu1  ;;  %v790_v50 = vadd.f32 %v789_v37, %v702_v10 }
 0x12b   :  { %v770_v54 = vpop.f32.mrf.mxu0 }
 0x12c   :  { %v1761_v56 = vadd.f32 %v770_v54, %v683_v55  ;;  %v802_v58 = vpop.f32.mrf.mxu1  ;;  %v1266_v55 = vadd.f32 %v1716_v2, %v1714_v0  ;;  %v1220_v0 = vadd.f32 %v1736_v18, %v1732_v16  ;;  %v1278_v16 = vadd.f32 %v1738_v19, %v1734_v17 }
 0x12d   :  { %v1314_v39 = vpop.f32.mrf.mxu0  ;;  %v787_v18 = vadd.f32 %v1744_v30, %v699_v6 }
 0x12e   :  { %v811_v28 = vadd.f32 %v810_v52, %v1761_v56  ;;  %v1330_v29 = vpop.f32.mrf.mxu1  ;;  %v694_v45 = vadd.f32 %v1266_v55, %v606_v38  ;;  %v622_v22 = vadd.f32 %v1220_v0, %v1698_v12  ;;  %v795_v52 = vadd.f32 %v794_v44, %v707_v51 }
 0x12f   :  { %v773_v47 = vpop.f32.mrf.mxu0  ;;  %v803_v39 = vadd.f32 %v802_v58, %v715_v15  ;;  %v881_v15 = vlaneseq }
 0x130   :  { %v774_v33 = vadd.f32 %v773_v47, %v1712_v62  ;;  %v805_v57 = vpop.f32.mrf.mxu1  ;;  %v710_v53 = vadd.f32 %v1278_v16, %v622_v22 }
 0x131   :  { %v1315_v34 = vpop.f32.mrf.mxu0  ;;  %v820_v12 = vsel %vm819_vm2, %v803_v39, 0.0 }
 0x132   :  { %v812_v40 = vadd.f32 %v811_v28, %v774_v33  ;;  %v1331_v42 = vpop.f32.mrf.mxu1  ;;  %v798_v25 = vadd.f32 %v797_v31, %v710_v53  ;;  %v876_v53 = vld [vmem:[%s1838_s3] sm:$0x1] }
 0x133   :  { %v778_v59 = vpop.f32.mrf.mxu0 }
 0x134   :  { %v779_v62 = vadd.f32 %v778_v59, %v691_v41 }
 0x135   :  { %v1318_v9 = vpop.f32.mrf.mxu0 }
 0x136   :  { %v813_v2 = vadd.f32 %v812_v40, %v779_v62 }
 0x137   :  { %v781_v46 = vpop.f32.mrf.mxu0 }
 0x138   :  { %v782_v11 = vadd.f32 %v781_v46, %v694_v45 }
 0x139   :  { %v1319_v20 = vpop.f32.mrf.mxu0 }
 0x13a   :  { %v814_v23 = vadd.f32 %v813_v2, %v782_v11 }
 0x13c   :  { %v815_v13 = vadd.f32 %v814_v23, %v787_v18 }
 0x13e   :  { %v816_v54 = vadd.f32 %v815_v13, %v790_v50 }
 0x140   :  { %v817_v21 = vadd.f32 %v816_v54, %v795_v52 }
 0x142   :  { %v818_v24 = vadd.f32 %v817_v21, %v798_v25 }
 0x144   :  { %v821_v26 = vadd.f32 %v820_v12, %v818_v24 }
 0x146   :  { %v822_v27 = vrot.slane %v821_v26, 4 }
 0x148   :  { %v823_v17 = vadd.f32 %v822_v27, %v821_v26 }
 0x14a   :  { %v824_v19 = vrot.slane %v823_v17, 2 }
 0x14c   :  { %v825_v30 = vadd.f32 %v824_v19, %v823_v17  ;;  %v1107_v17 = vld [vmem:[%s1839_s4] ss:$0 sm:$0xff] }
 0x14e   :  { %v826_v28 = vrot.slane %v825_v30, 1 }
 0x150   :  { %v827_v37 = vadd.f32 %v826_v28, %v825_v30 }
 0x152   :  { %v829_v29 = vmul.f32 0.010204081, %v827_v37 }
 0x154   :  { %v830_v47 = vsub.f32 %v1747_v35, %v829_v29  ;;  %v831_v44 = vsub.f32 %v1750_v36, %v829_v29  ;;  %v832_v58 = vsub.f32 %v1755_v43, %v829_v29  ;;  %v833_v31 = vsub.f32 %v1758_v49, %v829_v29 }
 0x155   :  { %v834_v32 = vsub.f32 %v1761_v56, %v829_v29  ;;  %v835_v57 = vsub.f32 %v774_v33, %v829_v29  ;;  %v836_v60 = vsub.f32 %v779_v62, %v829_v29  ;;  %v837_v63 = vsub.f32 %v782_v11, %v829_v29 }
 0x156   :  { %v843_v34 = vmul.f32 %v830_v47, %v830_v47  ;;  %v844_v38 = vmul.f32 %v831_v44, %v831_v44  ;;  %v845_v55 = vmul.f32 %v832_v58, %v832_v58  ;;  %v846_v41 = vmul.f32 %v833_v31, %v833_v31 }
 0x157   :  { %v847_v59 = vmul.f32 %v834_v32, %v834_v32  ;;  %v848_v35 = vmul.f32 %v835_v57, %v835_v57  ;;  %v838_v36 = vsub.f32 %v787_v18, %v829_v29  ;;  %v849_v3 = vmul.f32 %v836_v60, %v836_v60 }
 0x158   :  { %v856_v40 = vadd.f32 %v844_v38, %v843_v34  ;;  %v839_v5 = vsub.f32 %v790_v50, %v829_v29  ;;  %v850_v49 = vmul.f32 %v837_v63, %v837_v63  ;;  %v840_v56 = vsub.f32 %v795_v52, %v829_v29 }
 0x159   :  { %v851_v33 = vmul.f32 %v838_v36, %v838_v36  ;;  %v842_v9 = vsub.f32 %v803_v39, %v829_v29  ;;  %v841_v0 = vsub.f32 %v798_v25, %v829_v29  ;;  %v882_v52 = vshrl.u32 %v881_v15, 7 }
 0x15a   :  { %v857_v42 = vadd.f32 %v856_v40, %v845_v55  ;;  %v852_v2 = vmul.f32 %v839_v5, %v839_v5  ;;  %v853_v46 = vmul.f32 %v840_v56, %v840_v56 }
 0x15b   :  { %v855_v4 = vmul.f32 %v842_v9, %v842_v9  ;;  %v854_v6 = vmul.f32 %v841_v0, %v841_v0  ;;  %v883_v54 = vsub.s32 0, %v882_v52 }
 0x15c   :  { %v858_v61 = vadd.f32 %v857_v42, %v846_v41 }
 0x15d   :  { %v867_v8 = vsel %vm819_vm2, %v855_v4, 0.0 }
 0x15e   :  { %v859_v1 = vadd.f32 %v858_v61, %v847_v59 }
 0x160   :  { %v860_v43 = vadd.f32 %v859_v1, %v848_v35 }
 0x162   :  { %v861_v7 = vadd.f32 %v860_v43, %v849_v3 }
 0x164   :  { %v862_v62 = vadd.f32 %v861_v7, %v850_v49 }
 0x166   :  { %v863_v45 = vadd.f32 %v862_v62, %v851_v33 }
 0x168   :  { %v864_v48 = vadd.f32 %v863_v45, %v852_v2 }
 0x16a   :  { %v865_v11 = vadd.f32 %v864_v48, %v853_v46 }
 0x16c   :  { %v866_v14 = vadd.f32 %v865_v11, %v854_v6 }
 0x16e   :  { %v868_v10 = vadd.f32 %v867_v8, %v866_v14 }
 0x170   :  { %v869_v20 = vrot.slane %v868_v10, 4 }
 0x172   :  { %v870_v22 = vadd.f32 %v869_v20, %v868_v10 }
 0x174   :  { %v871_v16 = vrot.slane %v870_v22, 2 }
 0x176   :  { %v872_v18 = vadd.f32 %v871_v16, %v870_v22 }
 0x178   :  { %v873_v23 = vrot.slane %v872_v18, 1 }
 0x17a   :  { %v874_v50 = vadd.f32 %v873_v23, %v872_v18 }
 0x17c   :  { %v875_v51 = vmul.f32 0.010204081, %v874_v50 }
 0x17e   :  { %v877_v13 = vadd.f32 1e-05, %v875_v51 }
 0x180   :  { %1425 = vrsqrt.f32 %v877_v13 }
 0x18d   :  { %v1426_v39 = vpop.eup %1425 }
 0x18e   :  { %v879_v25 = vmul.f32 %v1426_v39, %v876_v53 }
 0x190   :  { %v884_v21 = vrot.slane %v879_v25, %v883_v54 }
 0x192   :  { %v886_v24 = vmul.f32 %v884_v21, %v830_v47  ;;  %v887_v12 = vmul.f32 %v884_v21, %v831_v44  ;;  %v888_v26 = vmul.f32 %v884_v21, %v832_v58  ;;  %v889_v27 = vmul.f32 %v884_v21, %v833_v31 }
 0x193   :  { %v890_v19 = vmul.f32 %v884_v21, %v834_v32  ;;  %v891_v30 = vmul.f32 %v884_v21, %v835_v57  ;;  %v892_v28 = vmul.f32 %v884_v21, %v836_v60  ;;  %v893_v37 = vmul.f32 %v884_v21, %v837_v63 }
 0x194   :  { %v894_v29 = vmul.f32 %v884_v21, %v838_v36  ;;  %v895_v34 = vmul.f32 %v884_v21, %v839_v5  ;;  %v896_v38 = vmul.f32 %v884_v21, %v840_v56  ;;  %v897_v55 = vmul.f32 %v884_v21, %v841_v0 }
 0x195   :  { %v898_v40 = vmul.f32 %v884_v21, %v842_v9  ;;  %v906_v41 = vadd.f32 %v1107_v17, %v886_v24  ;;  %v907_v42 = vadd.f32 %v1107_v17, %v887_v12  ;;  %v908_v59 = vadd.f32 %v1107_v17, %v888_v26 }
 0x196   :  { %v909_v47 = vadd.f32 %v1107_v17, %v889_v27  ;;  %v910_v44 = vadd.f32 %v1107_v17, %v890_v19  ;;  %v911_v58 = vadd.f32 %v1107_v17, %v891_v30  ;;  %v912_v31 = vadd.f32 %v1107_v17, %v892_v28 }
 0x197   :  { %v913_v61 = vadd.f32 %v1107_v17, %v893_v37  ;;  %v914_v35 = vadd.f32 %v1107_v17, %v894_v29  ;;  %v915_v1 = vadd.f32 %v1107_v17, %v895_v34  ;;  %v916_v3 = vadd.f32 %v1107_v17, %v896_v38 }
 0x198   :  { %v917_v32 = vadd.f32 %v1107_v17, %v897_v55  ;;  %v918_v57 = vadd.f32 %v1107_v17, %v898_v40  ;;  %vm919_vm3 = vcmp.gt.f32.partialorder %v906_v41, 0.0  ;;  %vm920_vm4 = vcmp.gt.f32.partialorder %v907_v42, 0.0 }
 0x199   :  { %vm921_vm5 = vcmp.gt.f32.partialorder %v908_v59, 0.0  ;;  %vm922_vm6 = vcmp.gt.f32.partialorder %v909_v47, 0.0  ;;  %vm923_vm7 = vcmp.gt.f32.partialorder %v910_v44, 0.0  ;;  %vm924_vm8 = vcmp.gt.f32.partialorder %v911_v58, 0.0 }
 0x19a   :  { %vm925_vm9 = vcmp.gt.f32.partialorder %v912_v31, 0.0  ;;  %vm926_vm10 = vcmp.gt.f32.partialorder %v913_v61, 0.0  ;;  %vm927_vm11 = vcmp.gt.f32.partialorder %v914_v35, 0.0  ;;  %vm928_vm12 = vcmp.gt.f32.partialorder %v915_v1, 0.0 }
 0x19b   :  { %vm929_vm13 = vcmp.gt.f32.partialorder %v916_v3, 0.0  ;;  %vm930_vm14 = vcmp.gt.f32.partialorder %v917_v32, 0.0  ;;  %vm931_vm15 = vcmp.gt.f32.partialorder %v918_v57, 0.0  ;;  %v932_v60 = vmul.f32 0.01, %v906_v41 }
 0x19c   :  { %v933_v63 = vmul.f32 0.01, %v907_v42  ;;  %v934_v36 = vmul.f32 0.01, %v908_v59  ;;  %v935_v43 = vmul.f32 0.01, %v909_v47 }
 0x19d   :  { %v936_v5 = vmul.f32 0.01, %v910_v44  ;;  %v937_v49 = vmul.f32 0.01, %v911_v58  ;;  %v938_v7 = vmul.f32 0.01, %v912_v31  ;;  %v945_v56 = vsel %vm919_vm3, %v906_v41, %v932_v60 }
 0x19e   :  { %v939_v33 = vmul.f32 0.01, %v913_v61  ;;  %v940_v62 = vmul.f32 0.01, %v914_v35  ;;  %v941_v9 = vmul.f32 0.01, %v915_v1  ;;  %v946_v0 = vsel %vm920_vm4, %v907_v42, %v933_v63 }
 0x19f   :  { %v942_v2 = vmul.f32 0.01, %v916_v3  ;;  %v943_v45 = vmul.f32 0.01, %v917_v32  ;;  %v944_v46 = vmul.f32 0.01, %v918_v57  ;;  %v947_v48 = vsel %vm921_vm5, %v908_v59, %v934_v36 }
 0x1a0   :  { %v948_v4 = vsel %vm922_vm6, %v909_v47, %v935_v43  ;;  %v949_v6 = vsel %vm923_vm7, %v910_v44, %v936_v5  ;;  %v950_v11 = vsel %vm924_vm8, %v911_v58, %v937_v49  ;;  %v951_v14 = vsel %vm925_vm9, %v912_v31, %v938_v7 }
 0x1a1   :  { %v952_v8 = vsel %vm926_vm10, %v913_v61, %v939_v33  ;;  %v953_v10 = vsel %vm927_vm11, %v914_v35, %v940_v62  ;;  %v954_v20 = vsel %vm928_vm12, %v915_v1, %v941_v9  ;;  %v955_v22 = vsel %vm929_vm13, %v916_v3, %v942_v2 }
 0x1a2   :  { %v956_v16 = vsel %vm930_vm14, %v917_v32, %v943_v45  ;;  %v957_v18 = vsel %vm931_vm15, %v918_v57, %v944_v46  ;;  %v1137_v23 = vpack.c.bf16 %v946_v0, %v945_v56  ;;  %v1142_v50 = vpack.c.bf16 %v948_v4, %v947_v48 }
 0x1a3   :  { %v1133_v51 = vpack.c.bf16 %v957_v18, %v957_v18  ;;  %v1147_v13 = vpack.c.bf16 %v950_v11, %v949_v6  ;;  %v1152_v15 = vpack.c.bf16 %v952_v8, %v951_v14  ;;  %v1157_v52 = vpack.c.bf16 %v954_v20, %v953_v10 }
 0x1a4   :  { %1138 = vst [vmem:[%s1840_s5] sm:$0xff] %v1137_v23   ;;  %1164 = vst [vmem:[%s1840_s5 + $0x8] sm:$0xff] %v1142_v50   ;;  %v1162_v53 = vpack.c.bf16 %v956_v16, %v955_v22 }
 0x1a5   :  { %1165 = vst [vmem:[%s1840_s5 + $0x10] sm:$0xff] %v1147_v13   ;;  %1166 = vst [vmem:[%s1840_s5 + $0x18] sm:$0xff] %v1152_v15  }
 0x1a6   :  { %1167 = vst [vmem:[%s1840_s5 + $0x20] sm:$0xff] %v1157_v52   ;;  %1023 = vst [vmem:[%s1840_s5 + $0x30] sm:$0x1] %v1133_v51 }
 0x1a7   :  { %1168 = vst [vmem:[%s1840_s5 + $0x28] sm:$0xff] %v1162_v53  }

// kernel: discriminator_forward.5
= control target key start
LH: loop header
LB: loop body
LE: loop exit
PB: predicated region body
PF: predicated region fallthrough
CT: control target
= control target key end

     0   :  { %vm1407_vm0 = vcmask 1040384   ;;  %vm1397_vm1 = vcmask 72704   ;;  %vm1260_vm2 = vcmask 1041408   ;;  %vm1504_vm9 = vcmask 146432   ;;  %s2624_s1 = inlined_call_operand.vmem [shape: bf16[1152,256], index: 1, kind: input, shape index: {}]   ;;  %s2625_s0 = inlined_call_operand.vmem [shape: bf16[18,1152], index: 0, kind: input, shape index: {}]   ;;  %s2626_s5 = inlined_call_operand.vmem [shape: f32[9,256], index: 5, kind: input, shape index: {}]   ;;  %s2627_s6 = inlined_call_operand.vmem [shape: f32[18,9], index: 6, kind: input, shape index: {}]   ;;  %s2628_s2 = inlined_call_operand.vmem [shape: f32[1,256], index: 2, kind: input, shape index: {}]   ;;  %s2629_s3 = inlined_call_operand.vmem [shape: f32[1,256], index: 3, kind: input, shape index: {}]   ;;  %s2630_s4 = inlined_call_operand.vmem [shape: f32[1,256], index: 4, kind: input, shape index: {}]   ;;  %s2631_s7 = inlined_call_operand.vmem [shape: f32[2,18], index: 7, kind: input, shape index: {}]   ;;  %s2632_s8 = inlined_call_operand.<no memory space> [shape: f32[1,1], index: 8, kind: input, shape index: {}]   ;;  %s2633_s9 = inlined_call_operand.vmem [shape: f32[2,1], index: 9, kind: output, shape index: {}]  }
   0x1   :  { %v1784_v0 = vld [vmem:[%s2624_s1 + $0x74] ss:$8 sps:$4 sm:$0xff]   ;;  %v1786_v1 = vld [vmem:[%s2624_s1 + $0x70] ss:$8 sps:$4 sm:$0xff]   ;;  %v1790_v4 = vld [vmem:[%s2624_s1 + $0x64] ss:$8 sps:$4 sm:$0xff]  }
   0x2   :  { %1004 = vmatprep.subr.bf16.mxu0 %v1784_v0  ;;  %v1787_v2 = vld [vmem:[%s2624_s1 + $0x174] ss:$8 sps:$4 sm:$0xff]   ;;  %v1789_v3 = vld [vmem:[%s2624_s1 + $0x170] ss:$8 sps:$4 sm:$0xff]   ;;  %v1792_v5 = vld [vmem:[%s2624_s1 + $0x60] ss:$8 sps:$4 sm:$0xff]  }
   0x3   :  { %1005 = vmatpush1.bf16.msra.mxu0 %v1786_v1  ;;  %1055 = vmatprep.subr.bf16.mxu1 %v1787_v2  ;;  %v1793_v6 = vld [vmem:[%s2624_s1 + $0x164] ss:$8 sps:$4 sm:$0xff]   ;;  %v1795_v7 = vld [vmem:[%s2624_s1 + $0x160] ss:$8 sps:$4 sm:$0xff]   ;;  %v1796_v8 = vld [vmem:[%s2624_s1 + $0x54] ss:$8 sps:$4 sm:$0xff]  }
   0x4   :  { %1056 = vmatpush1.bf16.msra.mxu1 %v1789_v3  ;;  %1006 = vmatprep.subr.bf16.mxu0 %v1790_v4  ;;  %v1798_v9 = vld [vmem:[%s2624_s1 + $0x50] ss:$8 sps:$4 sm:$0xff]   ;;  %v1799_v10 = vld [vmem:[%s2624_s1 + $0x154] ss:$8 sps:$4 sm:$0xff]   ;;  %v1802_v11 = vld [vmem:[%s2624_s1 + $0x44] ss:$8 sps:$4 sm:$0xff]  }
   0x5   :  { %1057 = vmatprep.subr.bf16.mxu1 %v1793_v6  ;;  %v1801_v12 = vld [vmem:[%s2624_s1 + $0x150] ss:$8 sps:$4 sm:$0xff]   ;;  %v1805_v13 = vld [vmem:[%s2624_s1 + $0x144] ss:$8 sps:$4 sm:$0xff]   ;;  %v1804_v14 = vld [vmem:[%s2624_s1 + $0x40] ss:$8 sps:$4 sm:$0xff]  }
   0x6   :  { %v1808_v15 = vld [vmem:[%s2624_s1 + $0x34] ss:$8 sps:$4 sm:$0xff]   ;;  %v1807_v16 = vld [vmem:[%s2624_s1 + $0x140] ss:$8 sps:$4 sm:$0xff]   ;;  %v1810_v18 = vld [vmem:[%s2624_s1 + $0x30] ss:$8 sps:$4 sm:$0xff]  }
   0x7   :  { %1007 = vmatpush1.bf16.msra.mxu0 %v1792_v5  ;;  %v1811_v17 = vld [vmem:[%s2624_s1 + $0x134] ss:$8 sps:$4 sm:$0xff]   ;;  %v1814_v19 = vld [vmem:[%s2624_s1 + $0x24] ss:$8 sps:$4 sm:$0xff]   ;;  %v1813_v20 = vld [vmem:[%s2624_s1 + $0x130] ss:$8 sps:$4 sm:$0xff]  }
   0x8   :  { %1008 = vmatprep.subr.bf16.mxu0 %v1796_v8  ;;  %1058 = vmatpush1.bf16.msra.mxu1 %v1795_v7  ;;  %v1817_v21 = vld [vmem:[%s2624_s1 + $0x124] ss:$8 sps:$4 sm:$0xff]   ;;  %v1816_v22 = vld [vmem:[%s2624_s1 + $0x20] ss:$8 sps:$4 sm:$0xff]   ;;  %v1820_v23 = vld [vmem:[%s2624_s1 + $0x14] ss:$8 sps:$4 sm:$0xff]  }
   0x9   :  { %1059 = vmatprep.subr.bf16.mxu1 %v1799_v10  ;;  %v1819_v24 = vld [vmem:[%s2624_s1 + $0x120] ss:$8 sps:$4 sm:$0xff]   ;;  %v1823_v25 = vld [vmem:[%s2624_s1 + $0x114] ss:$8 sps:$4 sm:$0xff]   ;;  %v1822_v26 = vld [vmem:[%s2624_s1 + $0x10] ss:$8 sps:$4 sm:$0xff]  }
   0xa   :  { %v1826_v27 = vld [vmem:[%s2624_s1 + $0x4] ss:$8 sps:$4 sm:$0xff]   ;;  %v1825_v28 = vld [vmem:[%s2624_s1 + $0x110] ss:$8 sps:$4 sm:$0xff]   ;;  %v1828_v30 = vld [vmem:[%s2624_s1] ss:$8 sps:$4 sm:$0xff]  }
   0xb   :  { %1009 = vmatpush1.bf16.msra.mxu0 %v1798_v9  ;;  %v1829_v29 = vld [vmem:[%s2624_s1 + $0x104] ss:$8 sps:$4 sm:$0xff]   ;;  %v1832_v31 = vld [vmem:[%s2624_s1 + $0xf4] ss:$8 sps:$4 sm:$0xff]   ;;  %v1831_v32 = vld [vmem:[%s2624_s1 + $0x100] ss:$8 sps:$4 sm:$0xff]  }
   0xc   :  { %1010 = vmatprep.subr.bf16.mxu0 %v1802_v11  ;;  %1060 = vmatpush1.bf16.msra.mxu1 %v1801_v12  ;;  %v1835_v33 = vld [vmem:[%s2624_s1 + $0x1f4] ss:$8 sps:$4 sm:$0xff]   ;;  %v1834_v34 = vld [vmem:[%s2624_s1 + $0xf0] ss:$8 sps:$4 sm:$0xff]   ;;  %v1838_v35 = vld [vmem:[%s2624_s1 + $0xe4] ss:$8 sps:$4 sm:$0xff]  }
   0xd   :  { %1061 = vmatprep.subr.bf16.mxu1 %v1805_v13  ;;  %v1837_v36 = vld [vmem:[%s2624_s1 + $0x1f0] ss:$8 sps:$4 sm:$0xff]   ;;  %v1841_v37 = vld [vmem:[%s2624_s1 + $0x1e4] ss:$8 sps:$4 sm:$0xff]   ;;  %v1840_v38 = vld [vmem:[%s2624_s1 + $0xe0] ss:$8 sps:$4 sm:$0xff]  }
   0xe   :  { %v1844_v39 = vld [vmem:[%s2624_s1 + $0xd4] ss:$8 sps:$4 sm:$0xff]   ;;  %v1843_v40 = vld [vmem:[%s2624_s1 + $0x1e0] ss:$8 sps:$4 sm:$0xff]   ;;  %v1846_v42 = vld [vmem:[%s2624_s1 + $0xd0] ss:$8 sps:$4 sm:$0xff]  }
   0xf   :  { %1011 = vmatpush1.bf16.msra.mxu0 %v1804_v14  ;;  %v1847_v41 = vld [vmem:[%s2624_s1 + $0x1d4] ss:$8 sps:$4 sm:$0xff]   ;;  %v1850_v43 = vld [vmem:[%s2624_s1 + $0xc4] ss:$8 sps:$4 sm:$0xff]   ;;  %v1849_v44 = vld [vmem:[%s2624_s1 + $0x1d0] ss:$8 sps:$4 sm:$0xff]  }
  0x10   :  { %1012 = vmatprep.subr.bf16.mxu0 %v1808_v15  ;;  %1062 = vmatpush1.bf16.msra.mxu1 %v1807_v16  ;;  %v1853_v45 = vld [vmem:[%s2624_s1 + $0x1c4] ss:$8 sps:$4 sm:$0xff]   ;;  %v1852_v46 = vld [vmem:[%s2624_s1 + $0xc0] ss:$8 sps:$4 sm:$0xff]   ;;  %v1856_v48 = vld [vmem:[%s2624_s1 + $0xb4] ss:$8 sps:$4 sm:$0xff]  }
  0x11   :  { %1063 = vmatprep.subr.bf16.mxu1 %v1811_v17  ;;  %v1881_v47 = vld [vmem:[%s2625_s0 + $0x4] ss:$36 sps:$4 sm:$0xff]   ;;  %v1859_v50 = vld [vmem:[%s2624_s1 + $0x1b4] ss:$8 sps:$4 sm:$0xff]   ;;  %v1888_v51 = vld [vmem:[%s2625_s0 + $0xc] ss:$36 sps:$4 sm:$0xff]  }
  0x12   :  { %v1855_v49 = vld [vmem:[%s2624_s1 + $0x1c0] ss:$8 sps:$4 sm:$0xff]   ;;  %1036 = vmatprep.mubr.bf16.mxu0 %v1881_v47  ;;  %v1858_v52 = vld [vmem:[%s2624_s1 + $0xb0] ss:$8 sps:$4 sm:$0xff]   ;;  %v1862_v53 = vld [vmem:[%s2624_s1 + $0xa4] ss:$8 sps:$4 sm:$0xff]   ;;  %1087 = vmatprep.mubr.bf16.mxu1 %v1888_v51 }
  0x13   :  { %1013 = vmatpush1.bf16.msra.mxu0 %v1810_v18  ;;  %v1861_v54 = vld [vmem:[%s2624_s1 + $0x1b0] ss:$8 sps:$4 sm:$0xff]   ;;  %v1865_v55 = vld [vmem:[%s2624_s1 + $0x1a4] ss:$8 sps:$4 sm:$0xff]   ;;  %v1864_v56 = vld [vmem:[%s2624_s1 + $0xa0] ss:$8 sps:$4 sm:$0xff]  }
  0x14   :  { %1014 = vmatprep.subr.bf16.mxu0 %v1814_v19  ;;  %1064 = vmatpush1.bf16.msra.mxu1 %v1813_v20  ;;  %v1868_v57 = vld [vmem:[%s2624_s1 + $0x94] ss:$8 sps:$4 sm:$0xff]   ;;  %v1867_v58 = vld [vmem:[%s2624_s1 + $0x1a0] ss:$8 sps:$4 sm:$0xff]   ;;  %v1870_v60 = vld [vmem:[%s2624_s1 + $0x90] ss:$8 sps:$4 sm:$0xff]  }
  0x15   :  { %1065 = vmatprep.subr.bf16.mxu1 %v1817_v21  ;;  %v1871_v59 = vld [vmem:[%s2624_s1 + $0x194] ss:$8 sps:$4 sm:$0xff]   ;;  %v1874_v61 = vld [vmem:[%s2624_s1 + $0x84] ss:$8 sps:$4 sm:$0xff]   ;;  %v1873_v62 = vld [vmem:[%s2624_s1 + $0x190] ss:$8 sps:$4 sm:$0xff]  }
  0x16   :  { %v1877_v63 = vld [vmem:[%s2624_s1 + $0x184] ss:$8 sps:$4 sm:$0xff]   ;;  %v1876_v0 = vld [vmem:[%s2624_s1 + $0x80] ss:$8 sps:$4 sm:$0xff]   ;;  %v1885_v1 = vld [vmem:[%s2624_s1 + $0x274] ss:$8 sps:$4 sm:$0xff]  }
  0x17   :  { %1015 = vmatpush1.bf16.msra.mxu0 %v1816_v22  ;;  %v1882_v2 = vld [vmem:[%s2624_s1 + $0x180] ss:$8 sps:$4 sm:$0xff]   ;;  %v1891_v4 = vld [vmem:[%s2624_s1 + $0x374] ss:$8 sps:$4 sm:$0xff]   ;;  %v1883_v5 = vld [vmem:[%s2624_s1 + $0x270] ss:$8 sps:$4 sm:$0xff]  }
  0x18   :  { %1016 = vmatprep.subr.bf16.mxu0 %v1820_v23  ;;  %1066 = vmatpush1.bf16.msra.mxu1 %v1819_v24  ;;  %v1879_v3 = vld [vmem:[%s2625_s0] ss:$36 sps:$4 sm:$0xff]   ;;  %v1886_v6 = vld [vmem:[%s2625_s0 + $0x8] ss:$36 sps:$4 sm:$0xff]   ;;  %v1889_v8 = vld [vmem:[%s2624_s1 + $0x370] ss:$8 sps:$4 sm:$0xff]  }
  0x19   :  { %1067 = vmatprep.subr.bf16.mxu1 %v1823_v25  ;;  %v1894_v7 = vld [vmem:[%s2624_s1 + $0x264] ss:$8 sps:$4 sm:$0xff]   ;;  %v1892_v10 = vld [vmem:[%s2624_s1 + $0x260] ss:$8 sps:$4 sm:$0xff]   ;;  %v1900_v11 = vld [vmem:[%s2624_s1 + $0x254] ss:$8 sps:$4 sm:$0xff]  }
  0x1a   :  { %v1897_v9 = vld [vmem:[%s2624_s1 + $0x364] ss:$8 sps:$4 sm:$0xff]   ;;  %v1895_v12 = vld [vmem:[%s2624_s1 + $0x360] ss:$8 sps:$4 sm:$0xff]   ;;  %v1903_v13 = vld [vmem:[%s2624_s1 + $0x354] ss:$8 sps:$4 sm:$0xff]  }
  0x1b   :  { %1017 = vmatpush1.bf16.msra.mxu0 %v1822_v26  ;;  %v1898_v14 = vld [vmem:[%s2624_s1 + $0x250] ss:$8 sps:$4 sm:$0xff]   ;;  %v1906_v15 = vld [vmem:[%s2624_s1 + $0x244] ss:$8 sps:$4 sm:$0xff]   ;;  %v1904_v18 = vld [vmem:[%s2624_s1 + $0x240] ss:$8 sps:$4 sm:$0xff]  }
  0x1c   :  { %1018 = vmatprep.subr.bf16.mxu0 %v1826_v27  ;;  %1068 = vmatpush1.bf16.msra.mxu1 %v1825_v28  ;;  %v1901_v16 = vld [vmem:[%s2624_s1 + $0x350] ss:$8 sps:$4 sm:$0xff]   ;;  %v1909_v17 = vld [vmem:[%s2624_s1 + $0x344] ss:$8 sps:$4 sm:$0xff]   ;;  %v1912_v19 = vld [vmem:[%s2624_s1 + $0x234] ss:$8 sps:$4 sm:$0xff]  }
  0x1d   :  { %1069 = vmatprep.subr.bf16.mxu1 %v1829_v29  ;;  %v1907_v20 = vld [vmem:[%s2624_s1 + $0x340] ss:$8 sps:$4 sm:$0xff]   ;;  %v1915_v21 = vld [vmem:[%s2624_s1 + $0x334] ss:$8 sps:$4 sm:$0xff]   ;;  %v1910_v23 = vld [vmem:[%s2624_s1 + $0x230] ss:$8 sps:$4 sm:$0xff]  }
  0x1e   :  { %v45_v22 = vld [vmem:[%s2625_s0 + $0x48] sm:$0x11]  ;;  %v1913_v27 = vld [vmem:[%s2624_s1 + $0x330] ss:$8 sps:$4 sm:$0xff]   ;;  %v1948_v51 = vld [vmem:[%s2624_s1 + $0x2d4] ss:$8 sps:$4 sm:$0xff]  }
  0x1f   :  { %1019 = vmatpush1.bf16.msra.mxu0 %v1828_v30  ;;  %v1620_v24 = vcombine.high %v45_v22, %v45_v22  ;;  %v1619_v25 = vcombine.low %v45_v22, %v45_v22  ;;  %v1918_v26 = vld [vmem:[%s2624_s1 + $0x224] ss:$8 sps:$4 sm:$0xff]   ;;  %v1916_v28 = vld [vmem:[%s2624_s1 + $0x220] ss:$8 sps:$4 sm:$0xff]   ;;  %v46_v30 = vld [vmem:[%s2625_s0 + $0x50] sm:$0x11] }
  0x20   :  { %1020 = vmatprep.subr.bf16.mxu0 %v1832_v31  ;;  %1070 = vmatpush1.bf16.msra.mxu1 %v1831_v32  ;;  %v1921_v29 = vld [vmem:[%s2624_s1 + $0x324] ss:$8 sps:$4 sm:$0xff]   ;;  %v1924_v31 = vld [vmem:[%s2624_s1 + $0x214] ss:$8 sps:$4 sm:$0xff]   ;;  %v1622_v32 = vcombine.high %v46_v30, %v46_v30  ;;  %v1395_v22 = vld [vmem:[%s2626_s5 + $0x10] sm:$0x1] }
  0x21   :  { %1071 = vmatprep.subr.bf16.mxu1 %v1835_v33  ;;  %v1621_v33 = vcombine.low %v46_v30, %v46_v30  ;;  %v1942_v47 = vld [vmem:[%s2624_s1 + $0x2e4] ss:$8 sps:$4 sm:$0xff]   ;;  %vm1604_vm10 = vcmask 1024  }
  0x22   :  { %v2007_v30 = vld [vmem:[%s2624_s1 + $0x444] ss:$8 sps:$4 sm:$0xff]  }
  0x23   :  { %1021 = vmatpush2.bf16.msra.mxu0 %v1834_v34  ;;  %v1919_v34 = vld [vmem:[%s2624_s1 + $0x320] ss:$8 sps:$4 sm:$0xff]  }
  0x24   :  { %1022 = vmatprep.subr.bf16.mxu0 %v1838_v35  ;;  %1072 = vmatpush2.bf16.msra.mxu1 %v1837_v36  ;;  %v1927_v35 = vld [vmem:[%s2624_s1 + $0x314] ss:$8 sps:$4 sm:$0xff]   ;;  %v1922_v36 = vld [vmem:[%s2624_s1 + $0x210] ss:$8 sps:$4 sm:$0xff]  }
  0x25   :  { %1073 = vmatprep.subr.bf16.mxu1 %v1841_v37  ;;  %v1930_v37 = vld [vmem:[%s2624_s1 + $0x204] ss:$8 sps:$4 sm:$0xff]  }
  0x27   :  { %1023 = vmatpush2.bf16.msra.mxu0 %v1840_v38  ;;  %v1925_v38 = vld [vmem:[%s2624_s1 + $0x310] ss:$8 sps:$4 sm:$0xff]  }
  0x28   :  { %1024 = vmatprep.subr.bf16.mxu0 %v1844_v39  ;;  %1074 = vmatpush2.bf16.msra.mxu1 %v1843_v40  ;;  %v1988_v39 = vld [vmem:[%s2625_s0 + $0x14] ss:$36 sps:$4 sm:$0xff]   ;;  %v1933_v40 = vld [vmem:[%s2624_s1 + $0x304] ss:$8 sps:$4 sm:$0xff]  }
  0x29   :  { %1075 = vmatprep.subr.bf16.mxu1 %v1847_v41  ;;  %v1928_v41 = vld [vmem:[%s2624_s1 + $0x200] ss:$8 sps:$4 sm:$0xff]  }
  0x2b   :  { %1025 = vmatpush2.bf16.msra.mxu0 %v1846_v42  ;;  %v1936_v42 = vld [vmem:[%s2624_s1 + $0x2f4] ss:$8 sps:$4 sm:$0xff]  }
  0x2c   :  { %1026 = vmatprep.subr.bf16.mxu0 %v1850_v43  ;;  %1076 = vmatpush2.bf16.msra.mxu1 %v1849_v44  ;;  %v1994_v43 = vld [vmem:[%s2625_s0 + $0x1c] ss:$36 sps:$4 sm:$0xff]  }
  0x2d   :  { %1077 = vmatprep.subr.bf16.mxu1 %v1853_v45  ;;  %v1931_v44 = vld [vmem:[%s2624_s1 + $0x300] ss:$8 sps:$4 sm:$0xff]   ;;  %v1939_v45 = vld [vmem:[%s2624_s1 + $0x3f4] ss:$8 sps:$4 sm:$0xff]  }
  0x2f   :  { %1027 = vmatpush2.bf16.msra.mxu0 %v1852_v46  ;;  %v1934_v46 = vld [vmem:[%s2624_s1 + $0x2f0] ss:$8 sps:$4 sm:$0xff]  }
  0x30   :  { %1028 = vmatprep.subr.bf16.mxu0 %v1856_v48  ;;  %1078 = vmatpush2.bf16.msra.mxu1 %v1855_v49  ;;  %v1937_v48 = vld [vmem:[%s2624_s1 + $0x3f0] ss:$8 sps:$4 sm:$0xff]   ;;  %v1945_v49 = vld [vmem:[%s2624_s1 + $0x3e4] ss:$8 sps:$4 sm:$0xff]  }
  0x31   :  { %1079 = vmatprep.subr.bf16.mxu1 %v1859_v50  ;;  %v1940_v50 = vld [vmem:[%s2624_s1 + $0x2e0] ss:$8 sps:$4 sm:$0xff]  }
  0x33   :  { %1029 = vmatpush2.bf16.msra.mxu0 %v1858_v52  ;;  %v1943_v52 = vld [vmem:[%s2624_s1 + $0x3e0] ss:$8 sps:$4 sm:$0xff]  }
  0x34   :  { %1030 = vmatprep.subr.bf16.mxu0 %v1862_v53  ;;  %1080 = vmatpush2.bf16.msra.mxu1 %v1861_v54  ;;  %v1951_v53 = vld [vmem:[%s2624_s1 + $0x3d4] ss:$8 sps:$4 sm:$0xff]   ;;  %v1946_v54 = vld [vmem:[%s2624_s1 + $0x2d0] ss:$8 sps:$4 sm:$0xff]  }
  0x35   :  { %1081 = vmatprep.subr.bf16.mxu1 %v1865_v55  ;;  %v1954_v55 = vld [vmem:[%s2624_s1 + $0x2c4] ss:$8 sps:$4 sm:$0xff]  }
  0x37   :  { %1031 = vmatpush2.bf16.msra.mxu0 %v1864_v56  ;;  %v1949_v56 = vld [vmem:[%s2624_s1 + $0x3d0] ss:$8 sps:$4 sm:$0xff]  }
  0x38   :  { %1032 = vmatprep.subr.bf16.mxu0 %v1868_v57  ;;  %1082 = vmatpush2.bf16.msra.mxu1 %v1867_v58  ;;  %v1957_v57 = vld [vmem:[%s2624_s1 + $0x3c4] ss:$8 sps:$4 sm:$0xff]   ;;  %v1952_v58 = vld [vmem:[%s2624_s1 + $0x2c0] ss:$8 sps:$4 sm:$0xff]  }
  0x39   :  { %1083 = vmatprep.subr.bf16.mxu1 %v1871_v59  ;;  %v1960_v59 = vld [vmem:[%s2624_s1 + $0x2b4] ss:$8 sps:$4 sm:$0xff]  }
  0x3b   :  { %1033 = vmatpush2.bf16.msra.mxu0 %v1870_v60  ;;  %v1955_v60 = vld [vmem:[%s2624_s1 + $0x3c0] ss:$8 sps:$4 sm:$0xff]  }
  0x3c   :  { %1034 = vmatprep.subr.bf16.mxu0 %v1874_v61  ;;  %1084 = vmatpush2.bf16.msra.mxu1 %v1873_v62  ;;  %v1964_v61 = vld [vmem:[%s2624_s1 + $0x3b4] ss:$8 sps:$4 sm:$0xff]   ;;  %v1958_v62 = vld [vmem:[%s2624_s1 + $0x2b0] ss:$8 sps:$4 sm:$0xff]  }
  0x3d   :  { %1085 = vmatprep.subr.bf16.mxu1 %v1877_v63  ;;  %v1968_v63 = vld [vmem:[%s2624_s1 + $0x2a4] ss:$8 sps:$4 sm:$0xff]  }
  0x3f   :  { %1035 = vmatpush2.bf16.msra.mxu0 %v1876_v0  ;;  %v1962_v0 = vld [vmem:[%s2624_s1 + $0x3b0] ss:$8 sps:$4 sm:$0xff]  }
  0x40   :  { %1106 = vmatprep.subr.bf16.mxu0 %v1885_v1  ;;  %1086 = vmatpush2.bf16.msra.mxu1 %v1882_v2  ;;  %v1971_v1 = vld [vmem:[%s2624_s1 + $0x3a4] ss:$8 sps:$4 sm:$0xff]   ;;  %v1966_v2 = vld [vmem:[%s2624_s1 + $0x2a0] ss:$8 sps:$4 sm:$0xff]  }
  0x41   :  { %1157 = vmatprep.subr.bf16.mxu1 %v1891_v4  ;;  %v1969_v4 = vld [vmem:[%s2624_s1 + $0x3a0] ss:$8 sps:$4 sm:$0xff]  }
  0x42   :  { %1037 = vmatmul.mubr.bf16.vlgmr.msra.gmra.mxu0 %v1879_v3  ;;  %v1975_v3 = vld [vmem:[%s2624_s1 + $0x294] ss:$8 sps:$4 sm:$0xff]  }
  0x43   :  { %1107 = vmatpush1.bf16.msra.mxu0 %v1883_v5  ;;  %1088 = vmatmul.mubr.bf16.vlgmr.msra.gmra.mxu1 %v1886_v6  ;;  %v1979_v5 = vld [vmem:[%s2624_s1 + $0x394] ss:$8 sps:$4 sm:$0xff]   ;;  %v1973_v6 = vld [vmem:[%s2624_s1 + $0x290] ss:$8 sps:$4 sm:$0xff]  }
  0x44   :  { %1108 = vmatprep.subr.bf16.mxu0 %v1894_v7  ;;  %1158 = vmatpush1.bf16.msra.mxu1 %v1889_v8  ;;  %v1982_v7 = vld [vmem:[%s2624_s1 + $0x284] ss:$8 sps:$4 sm:$0xff]   ;;  %v1977_v8 = vld [vmem:[%s2624_s1 + $0x390] ss:$8 sps:$4 sm:$0xff]  }
  0x45   :  { %1159 = vmatprep.subr.bf16.mxu1 %v1897_v9  ;;  %1046 = vmatprep.mubr.bf16.mxu0 %v1620_v24  ;;  %v1985_v9 = vld [vmem:[%s2624_s1 + $0x384] ss:$8 sps:$4 sm:$0xff]  }
  0x46   :  { %1097 = vmatprep.mubr.bf16.mxu1 %v1622_v32  ;;  %v1394_v24 = vld [vmem:[%s2626_s5 + $0x8] sm:$0xff]  ;;  %v2030_v32 = vmov 0  }
  0x47   :  { %1109 = vmatpush1.bf16.msra.mxu0 %v1892_v10  ;;  %v1980_v10 = vld [vmem:[%s2624_s1 + $0x280] ss:$8 sps:$4 sm:$0xff]  }
  0x48   :  { %1110 = vmatprep.subr.bf16.mxu0 %v1900_v11  ;;  %1160 = vmatpush1.bf16.msra.mxu1 %v1895_v12  ;;  %v1991_v11 = vld [vmem:[%s2624_s1 + $0x474] ss:$8 sps:$4 sm:$0xff]  }
  0x49   :  { %1161 = vmatprep.subr.bf16.mxu1 %v1903_v13  ;;  %v47_v12 = vld [vmem:[%s2625_s0 + $0x58] sm:$0x11]  ;;  %v1983_v13 = vld [vmem:[%s2624_s1 + $0x380] ss:$8 sps:$4 sm:$0xff]  }
  0x4a   :  { %1047 = vmatmul.mubr.bf16.gmra.mxu0 %v1619_v25  ;;  %v2002_v25 = vld [vmem:[%s2624_s1 + $0x454] ss:$8 sps:$4 sm:$0xff]  }
  0x4b   :  { %1111 = vmatpush1.bf16.msra.mxu0 %v1898_v14  ;;  %1098 = vmatmul.mubr.bf16.gmra.mxu1 %v1621_v33  ;;  %v1986_v14 = vld [vmem:[%s2625_s0 + $0x10] ss:$36 sps:$4 sm:$0xff]  }
  0x4c   :  { %1112 = vmatprep.subr.bf16.mxu0 %v1906_v15  ;;  %1162 = vmatpush1.bf16.msra.mxu1 %v1901_v16  ;;  %v48_v15 = vld [vmem:[%s2625_s0 + $0x60] sm:$0x11]  ;;  %v1989_v16 = vld [vmem:[%s2624_s1 + $0x470] ss:$8 sps:$4 sm:$0xff]   ;;  %v2010_v33 = vld [vmem:[%s2624_s1 + $0x434] ss:$8 sps:$4 sm:$0xff]  }
  0x4d   :  { %1163 = vmatprep.subr.bf16.mxu1 %v1909_v17  ;;  %1138 = vmatprep.mubr.bf16.mxu0 %v1988_v39  ;;  %v1624_v17 = vcombine.high %v47_v12, %v47_v12  ;;  %v2016_v39 = vld [vmem:[%s2624_s1 + $0x414] ss:$8 sps:$4 sm:$0xff]  }
  0x4e   :  { %1189 = vmatprep.mubr.bf16.mxu1 %v1994_v43  ;;  %v1392_v43 = vld [vmem:[%s2627_s6 + $0x10] sm:$0x3] }
  0x4f   :  { %1113 = vmatpush1.bf16.msra.mxu0 %v1904_v18  ;;  %v1396_v18 = vld [vmem:[%s2626_s5 + $0x18] sm:$0x1] }
  0x50   :  { %1114 = vmatprep.subr.bf16.mxu0 %v1912_v19  ;;  %1164 = vmatpush1.bf16.msra.mxu1 %v1907_v20  ;;  %v1992_v19 = vld [vmem:[%s2625_s0 + $0x18] ss:$36 sps:$4 sm:$0xff]   ;;  %v1997_v20 = vld [vmem:[%s2624_s1 + $0x464] ss:$8 sps:$4 sm:$0xff]  }
  0x51   :  { %1165 = vmatprep.subr.bf16.mxu1 %v1915_v21  ;;  %v1626_v21 = vcombine.high %v48_v15, %v48_v15 }
  0x53   :  { %1115 = vmatpush1.bf16.msra.mxu0 %v1910_v23  ;;  %v1995_v23 = vld [vmem:[%s2624_s1 + $0x460] ss:$8 sps:$4 sm:$0xff]  }
  0x54   :  { %1116 = vmatprep.subr.bf16.mxu0 %v1918_v26  ;;  %1166 = vmatpush1.bf16.msra.mxu1 %v1913_v27  ;;  %v1393_v26 = vld [vmem:[%s2626_s5] sm:$0xff]  ;;  %v1623_v27 = vcombine.low %v47_v12, %v47_v12 }
  0x55   :  { %1167 = vmatprep.subr.bf16.mxu1 %v1921_v29  ;;  %v1625_v29 = vcombine.low %v48_v15, %v48_v15 }
  0x57   :  { %1117 = vmatpush1.bf16.msra.mxu0 %v1916_v28  ;;  %v2000_v28 = vld [vmem:[%s2624_s1 + $0x450] ss:$8 sps:$4 sm:$0xff]  }
  0x58   :  { %1118 = vmatprep.subr.bf16.mxu0 %v1924_v31  ;;  %1168 = vmatpush1.bf16.msra.mxu1 %v1919_v34  ;;  %v2005_v31 = vld [vmem:[%s2624_s1 + $0x440] ss:$8 sps:$4 sm:$0xff]   ;;  %v2031_v34 = vmov 0.0  }
  0x59   :  { %1169 = vmatprep.subr.bf16.mxu1 %v1927_v35  ;;  %v2008_v35 = vld [vmem:[%s2624_s1 + $0x430] ss:$8 sps:$4 sm:$0xff]  }
  0x5b   :  { %1119 = vmatpush1.bf16.msra.mxu0 %v1922_v36  ;;  %v2013_v36 = vld [vmem:[%s2624_s1 + $0x424] ss:$8 sps:$4 sm:$0xff]  }
  0x5c   :  { %1120 = vmatprep.subr.bf16.mxu0 %v1930_v37  ;;  %1170 = vmatpush1.bf16.msra.mxu1 %v1925_v38  ;;  %v1390_v37 = vld [vmem:[%s2627_s6] sm:$0xff] }
  0x5d   :  { %1171 = vmatprep.subr.bf16.mxu1 %v1933_v40  ;;  %v2011_v38 = vld [vmem:[%s2624_s1 + $0x420] ss:$8 sps:$4 sm:$0xff]  }
  0x5e   :  { %v1391_v40 = vld [vmem:[%s2627_s6 + $0x8] sm:$0xff] }
  0x5f   :  { %1121 = vmatpush1.bf16.msra.mxu0 %v1928_v41  ;;  %v2014_v41 = vld [vmem:[%s2624_s1 + $0x410] ss:$8 sps:$4 sm:$0xff]  }
  0x60   :  { %1122 = vmatprep.subr.bf16.mxu0 %v1936_v42  ;;  %1172 = vmatpush1.bf16.msra.mxu1 %v1931_v44  ;;  %v2019_v42 = vld [vmem:[%s2624_s1 + $0x404] ss:$8 sps:$4 sm:$0xff]   ;;  %v2017_v44 = vld [vmem:[%s2624_s1 + $0x400] ss:$8 sps:$4 sm:$0xff]  }
  0x61   :  { %1173 = vmatprep.subr.bf16.mxu1 %v1939_v45  ;;  %v2020_v45 = vld [vmem:[%s2625_s0 + $0x20] ss:$36 sps:$4 sm:$0xff]  }
  0x63   :  { %1123 = vmatpush2.bf16.msra.mxu0 %v1934_v46  ;;  %v2021_v46 = vld [vmem:[%s2625_s0 + $0x68] ss:$0 sps:$4 sm:$0x11]  }
  0x64   :  { %1124 = vmatprep.subr.bf16.mxu0 %v1942_v47  ;;  %1174 = vmatpush2.bf16.msra.mxu1 %v1937_v48  ;;  %v196_v47 = vlaneseq }
  0x65   :  { %1175 = vmatprep.subr.bf16.mxu1 %v1945_v49 }
  0x66   :  { %v2583_v48 = vshrl.u32 %v196_v47, 7 }
  0x67   :  { %1125 = vmatpush2.bf16.msra.mxu0 %v1940_v50  ;;  %v194_v50 = vld [vmem:[%s2628_s2] sm:$0x3] }
  0x68   :  { %1126 = vmatprep.subr.bf16.mxu0 %v1948_v51  ;;  %1176 = vmatpush2.bf16.msra.mxu1 %v1943_v52  ;;  %v2586_v49 = vsub.s32 0, %v2583_v48  ;;  %v2592_v51 = vsub.s32 1, %v2583_v48 }
  0x69   :  { %1177 = vmatprep.subr.bf16.mxu1 %v1951_v53 }
  0x6a   :  { %v199_v52 = vrot.slane %v194_v50, %v2586_v49  ;;  %v203_v53 = vrot.slane %v194_v50, %v2592_v51 }
  0x6b   :  { %1127 = vmatpush2.bf16.msra.mxu0 %v1946_v54 }
  0x6c   :  { %1128 = vmatprep.subr.bf16.mxu0 %v1954_v55  ;;  %1178 = vmatpush2.bf16.msra.mxu1 %v1949_v56 }
  0x6d   :  { %1179 = vmatprep.subr.bf16.mxu1 %v1957_v57 }
  0x6f   :  { %1129 = vmatpush2.bf16.msra.mxu0 %v1952_v58 }
  0x70   :  { %1130 = vmatprep.subr.bf16.mxu0 %v1960_v59  ;;  %1180 = vmatpush2.bf16.msra.mxu1 %v1955_v60 }
  0x71   :  { %1181 = vmatprep.subr.bf16.mxu1 %v1964_v61 }
  0x73   :  { %1131 = vmatpush2.bf16.msra.mxu0 %v1958_v62 }
  0x74   :  { %1132 = vmatprep.subr.bf16.mxu0 %v1968_v63  ;;  %1182 = vmatpush2.bf16.msra.mxu1 %v1962_v0 }
  0x75   :  { %1183 = vmatprep.subr.bf16.mxu1 %v1971_v1 }
  0x77   :  { %1133 = vmatpush2.bf16.msra.mxu0 %v1966_v2 }
  0x78   :  { %1134 = vmatprep.subr.bf16.mxu0 %v1975_v3  ;;  %1184 = vmatpush2.bf16.msra.mxu1 %v1969_v4 }
  0x79   :  { %1185 = vmatprep.subr.bf16.mxu1 %v1979_v5 }
  0x7b   :  { %1135 = vmatpush2.bf16.msra.mxu0 %v1973_v6 }
  0x7c   :  { %1136 = vmatprep.subr.bf16.mxu0 %v1982_v7  ;;  %1186 = vmatpush2.bf16.msra.mxu1 %v1977_v8 }
  0x7d   :  { %1187 = vmatprep.subr.bf16.mxu1 %v1985_v9 }
  0x7f   :  { %1137 = vmatpush2.bf16.msra.mxu0 %v1980_v10 }
  0x80   :  { %1208 = vmatprep.subr.bf16.mxu0 %v1991_v11  ;;  %1188 = vmatpush2.bf16.msra.mxu1 %v1983_v13 }
  0x81   :  { %1772 = vmatprep.subr.msk.mxu1 %vm1407_vm0, %v1396_v18 }
  0x82   :  { %1139 = vmatmul.mubr.bf16.vlgmr.msra.gmra.mxu0 %v1986_v14 }
  0x83   :  { %1209 = vmatpush1.bf16.msra.mxu0 %v1989_v16  ;;  %1148 = vmatprep.mubr.bf16.mxu0 %v1624_v17 }
  0x84   :  { %1190 = vmatmul.mubr.bf16.vlgmr.msra.gmra.mxu1 %v1992_v19  ;;  %1210 = vmatprep.subr.bf16.mxu0 %v1997_v20 }
  0x85   :  { %1199 = vmatprep.mubr.bf16.mxu1 %v1626_v21  ;;  %1773 = vmatpush1.msk.msra.mxu1 %vm1407_vm0, %v1395_v22 }
  0x86   :  { %1444 = vmatprep.subr.mxu1 %v1394_v24 }
  0x87   :  { %1211 = vmatpush1.bf16.msra.mxu0 %v1995_v23  ;;  %1445 = vmatpush1.msra.mxu1 %v1393_v26 }
  0x88   :  { %1212 = vmatprep.subr.bf16.mxu0 %v2002_v25 }
  0x8a   :  { %1149 = vmatmul.mubr.bf16.gmra.mxu0 %v1623_v27 }
  0x8b   :  { %1213 = vmatpush1.bf16.msra.mxu0 %v2000_v28  ;;  %1240 = vmatprep.mubr.bf16.mxu0 %v2030_v32 }
  0x8c   :  { %1200 = vmatmul.mubr.bf16.gmra.mxu1 %v1625_v29  ;;  %1214 = vmatprep.subr.bf16.mxu0 %v2007_v30 }
  0x8d   :  { %1478 = vmatprep.mubr.f32.mxu1 %v2031_v34 }
  0x8f   :  { %1215 = vmatpush1.bf16.msra.mxu0 %v2005_v31 }
  0x90   :  { %1216 = vmatprep.subr.bf16.mxu0 %v2010_v33 }
  0x93   :  { %1217 = vmatpush1.bf16.msra.mxu0 %v2008_v35 }
  0x94   :  { %1218 = vmatprep.subr.bf16.mxu0 %v2013_v36  ;;  %1774 = vmatmul.mubr.msk.f32.vlgmr.msra.gmra.mxu1 %vm1397_vm1, %v1390_v37 }
  0x95   :  { %1484 = vmatprep.mubr.f32.mxu1 %v2031_v34 }
  0x97   :  { %1219 = vmatpush1.bf16.msra.mxu0 %v2011_v38 }
  0x98   :  { %1220 = vmatprep.subr.bf16.mxu0 %v2016_v39  ;;  %1775 = vmatmul.mubr.msk.f32.gmra.mxu1 %vm1397_vm1, %v1391_v40 }
  0x99   :  { %1490 = vmatprep.mubr.f32.mxu1 %v2031_v34 }
  0x9b   :  { %1221 = vmatpush1.bf16.msra.mxu0 %v2014_v41 }
  0x9c   :  { %1222 = vmatprep.subr.bf16.mxu0 %v2019_v42  ;;  %1776 = vmatmul.mubr.msk.f32.gmra.mxu1 %vm1397_vm1, %v1392_v43 }
  0x9d   :  { %1578 = vmatprep.mubr.f32.mxu1 %v2031_v34 }
  0x9f   :  { %1223 = vmatpush1.bf16.msra.mxu0 %v2017_v44 }
  0xa2   :  { %1241 = vmatmul.mubr.bf16.vlgmr.msra.gmra.mxu0 %v2020_v45 }
  0xa3   :  { %1250 = vmatprep.mubr.bf16.mxu0 %v2030_v32 }
  0xaa   :  { %1251 = vmatmul.mubr.bf16.gmra.mxu0 %v2021_v46 }
 0x102   :  { %v1038_v54 = vpop.f32.mrf.mxu0 }
 0x103   :  { %v1039_v55 = vadd.f32 %v1038_v54, %v199_v52  ;;  %v1089_v57 = vpop.f32.mrf.mxu1 }
 0x104   :  { %v1040_v56 = vpop.f32.mrf.mxu0 }
 0x105   :  { %v1041_v58 = vadd.f32 %v1040_v56, %v203_v53  ;;  %v1090_v59 = vadd.f32 %v1089_v57, %v1039_v55  ;;  %v1091_v61 = vpop.f32.mrf.mxu1 }
 0x106   :  { %v1042_v60 = vpop.f32.mrf.mxu0 }
 0x107   :  { %v1043_v62 = vadd.f32 %v1042_v60, %v199_v52  ;;  %v1092_v63 = vadd.f32 %v1091_v61, %v1041_v58  ;;  %v1093_v1 = vpop.f32.mrf.mxu1 }
 0x108   :  { %v1044_v0 = vpop.f32.mrf.mxu0 }
 0x109   :  { %v1045_v2 = vadd.f32 %v1044_v0, %v203_v53  ;;  %v1094_v3 = vadd.f32 %v1093_v1, %v1043_v62  ;;  %v1095_v4 = vpop.f32.mrf.mxu1 }
 0x10a   :  { %v1048_v6 = vpop.f32.mrf.mxu0 }
 0x10b   :  { %v1096_v5 = vadd.f32 %v1095_v4, %v1045_v2  ;;  %v1049_v7 = vadd.f32 %v1048_v6, %v199_v52  ;;  %v1099_v11 = vpop.f32.mrf.mxu1 }
 0x10c   :  { %v1050_v8 = vpop.f32.mrf.mxu0 }
 0x10d   :  { %v1051_v9 = vadd.f32 %v1050_v8, %v203_v53  ;;  %v1100_v13 = vadd.f32 %v1099_v11, %v1049_v7  ;;  %v1101_v14 = vpop.f32.mrf.mxu1 }
 0x10e   :  { %v1052_v10 = vpop.f32.mrf.mxu0 }
 0x10f   :  { %v1102_v15 = vadd.f32 %v1101_v14, %v1051_v9  ;;  %v1103_v16 = vpop.f32.mrf.mxu1 }
 0x110   :  { %v1053_v12 = vpop.f32.mrf.mxu0 }
 0x111   :  { %v1104_v17 = vpop.f32.mrf.mxu1 }
 0x142   :  { %v1140_v18 = vpop.f32.mrf.mxu0 }
 0x143   :  { %v1141_v34 = vadd.f32 %v1140_v18, %v1090_v59 }
 0x144   :  { %v1142_v19 = vpop.f32.mrf.mxu0  ;;  %v1191_v20 = vpop.f32.mrf.mxu1 }
 0x145   :  { %v1143_v36 = vadd.f32 %v1142_v19, %v1092_v63  ;;  %v1192_v40 = vadd.f32 %v1191_v20, %v1141_v34 }
 0x146   :  { %v1144_v21 = vpop.f32.mrf.mxu0  ;;  %v1193_v22 = vpop.f32.mrf.mxu1 }
 0x147   :  { %v1145_v35 = vadd.f32 %v1144_v21, %v1094_v3  ;;  %v1194_v43 = vadd.f32 %v1193_v22, %v1143_v36 }
 0x148   :  { %v1146_v23 = vpop.f32.mrf.mxu0  ;;  %v1195_v24 = vpop.f32.mrf.mxu1 }
 0x149   :  { %v1147_v38 = vadd.f32 %v1146_v23, %v1096_v5  ;;  %v1196_v41 = vadd.f32 %v1195_v24, %v1145_v35 }
 0x14a   :  { %v1150_v25 = vpop.f32.mrf.mxu0  ;;  %v1197_v26 = vpop.f32.mrf.mxu1 }
 0x14b   :  { %v1151_v42 = vadd.f32 %v1150_v25, %v1100_v13  ;;  %v1198_v45 = vadd.f32 %v1197_v26, %v1147_v38 }
 0x14c   :  { %v1152_v27 = vpop.f32.mrf.mxu0  ;;  %v1201_v28 = vpop.f32.mrf.mxu1 }
 0x14d   :  { %v1153_v46 = vadd.f32 %v1152_v27, %v1102_v15  ;;  %v1202_v53 = vadd.f32 %v1201_v28, %v1151_v42 }
 0x14e   :  { %v1203_v29 = vpop.f32.mrf.mxu1  ;;  %v1154_v30 = vpop.f32.mrf.mxu0 }
 0x14f   :  { %v1204_v58 = vadd.f32 %v1203_v29, %v1153_v46 }
 0x150   :  { %v1155_v31 = vpop.f32.mrf.mxu0  ;;  %v1205_v32 = vpop.f32.mrf.mxu1 }
 0x152   :  { %v1206_v33 = vpop.f32.mrf.mxu1 }
 0x162   :  { %v1242_v37 = vpop.f32.mrf.mxu0 }
 0x163   :  { %v1243_v47 = vadd.f32 %v1242_v37, %v1192_v40 }
 0x164   :  { %v1244_v39 = vpop.f32.mrf.mxu0 }
 0x165   :  { %v1245_v54 = vadd.f32 %v1244_v39, %v1194_v43 }
 0x166   :  { %v1246_v44 = vpop.f32.mrf.mxu0 }
 0x167   :  { %v1247_v50 = vadd.f32 %v1246_v44, %v1196_v41 }
 0x168   :  { %v1248_v52 = vpop.f32.mrf.mxu0 }
 0x169   :  { %v1259_v55 = vadd.f32 %v1247_v50, %v1243_v47  ;;  %v1249_v56 = vadd.f32 %v1248_v52, %v1198_v45 }
 0x16a   :  { %v1252_v57 = vpop.f32.mrf.mxu0 }
 0x16b   :  { %v1269_v59 = vadd.f32 %v1249_v56, %v1245_v54  ;;  %v1253_v60 = vadd.f32 %v1252_v57, %v1202_v53 }
 0x16c   :  { %v1254_v61 = vpop.f32.mrf.mxu0 }
 0x16d   :  { %v1261_v62 = vsel %vm1260_vm2, %v1253_v60, 0.0  ;;  %v1255_v63 = vadd.f32 %v1254_v61, %v1204_v58 }
 0x16e   :  { %v1262_v0 = vadd.f32 %v1261_v62, %v1259_v55  ;;  %v1256_v1 = vpop.f32.mrf.mxu0 }
 0x16f   :  { %v1270_v2 = vsel %vm1260_vm2, %v1255_v63, 0.0  ;;  %v1313_v1 = vld [vmem:[%s2629_s3] sm:$0x3] }
 0x170   :  { %v1263_v3 = vrot.slane %v1262_v0, 4  ;;  %v1271_v4 = vadd.f32 %v1270_v2, %v1269_v59  ;;  %v1257_v5 = vpop.f32.mrf.mxu0 }
 0x171   :  { %v1354_v5 = vld [vmem:[%s2630_s4] sm:$0x3] }
 0x172   :  { %v1264_v6 = vadd.f32 %v1263_v3, %v1262_v0  ;;  %v1272_v7 = vrot.slane %v1271_v4, 4 }
 0x174   :  { %v1265_v8 = vrot.slane %v1264_v6, 2  ;;  %v1273_v9 = vadd.f32 %v1272_v7, %v1271_v4 }
 0x176   :  { %v1266_v10 = vadd.f32 %v1265_v8, %v1264_v6  ;;  %v1274_v11 = vrot.slane %v1273_v9, 2  ;;  %v1363_v8 = vrot.slane %v1354_v5, %v2592_v51 }
 0x178   :  { %v1267_v12 = vrot.slane %v1266_v10, 1  ;;  %v1275_v13 = vadd.f32 %v1274_v11, %v1273_v9 }
 0x17a   :  { %v1268_v14 = vadd.f32 %v1267_v12, %v1266_v10  ;;  %v1276_v15 = vrot.slane %v1275_v13, 1 }
 0x17c   :  { %v1279_v16 = vmul.f32 0.055555556, %v1268_v14  ;;  %v1277_v17 = vadd.f32 %v1276_v15, %v1275_v13 }
 0x17e   :  { %v1281_v18 = vsub.f32 %v1243_v47, %v1279_v16  ;;  %v1283_v19 = vsub.f32 %v1247_v50, %v1279_v16  ;;  %v1285_v20 = vsub.f32 %v1253_v60, %v1279_v16  ;;  %v1280_v21 = vmul.f32 0.055555556, %v1277_v17 }
 0x180   :  { %v1287_v22 = vmul.f32 %v1281_v18, %v1281_v18  ;;  %v1289_v23 = vmul.f32 %v1283_v19, %v1283_v19  ;;  %v1291_v24 = vmul.f32 %v1285_v20, %v1285_v20  ;;  %v1282_v25 = vsub.f32 %v1245_v54, %v1280_v21 }
 0x181   :  { %v1284_v26 = vsub.f32 %v1249_v56, %v1280_v21  ;;  %v1286_v27 = vsub.f32 %v1255_v63, %v1280_v21  ;;  %v2032_v56 = vmov 1966171168   ;;  %v1480_v63 = vpop.f32.mrf.mxu1 }
 0x182   :  { %v1293_v28 = vadd.f32 %v1289_v23, %v1287_v22  ;;  %v1294_v29 = vsel %vm1260_vm2, %v1291_v24, 0.0  ;;  %v1288_v30 = vmul.f32 %v1282_v25, %v1282_v25  ;;  %v1322_v57 = vunpack.c.l.s4 %v2032_v56 }
 0x183   :  { %v1290_v31 = vmul.f32 %v1284_v26, %v1284_v26  ;;  %v1292_v32 = vmul.f32 %v1286_v27, %v1286_v27  ;;  %v1482_v3 = vpop.f32.mrf.mxu1 }
 0x184   :  { %v1295_v33 = vadd.f32 %v1294_v29, %v1293_v28  ;;  %v1323_v58 = vunpack.c.0.s8 %v1322_v57 }
 0x185   :  { %v1302_v34 = vadd.f32 %v1290_v31, %v1288_v30  ;;  %v1303_v35 = vsel %vm1260_vm2, %v1292_v32, 0.0  ;;  %v1486_v9 = vpop.f32.mrf.mxu1 }
 0x186   :  { %v1296_v36 = vrot.slane %v1295_v33, 4  ;;  %v1326_v60 = vsub.s32 %v1323_v58, %v2583_v48  ;;  %v1359_v48 = vrot.slane %v1354_v5, %v2586_v49 }
 0x187   :  { %v1304_v37 = vadd.f32 %v1303_v35, %v1302_v34  ;;  %v1488_v17 = vpop.f32.mrf.mxu1 }
 0x188   :  { %v1297_v38 = vadd.f32 %v1296_v36, %v1295_v33 }
 0x189   :  { %v1305_v39 = vrot.slane %v1304_v37, 4 }
 0x18a   :  { %v1298_v40 = vrot.slane %v1297_v38, 2 }
 0x18b   :  { %v1306_v41 = vadd.f32 %v1305_v39, %v1304_v37 }
 0x18c   :  { %v1299_v42 = vadd.f32 %v1298_v40, %v1297_v38 }
 0x18d   :  { %v1307_v43 = vrot.slane %v1306_v41, 2 }
 0x18e   :  { %v1300_v44 = vrot.slane %v1299_v42, 1 }
 0x18f   :  { %v1308_v45 = vadd.f32 %v1307_v43, %v1306_v41  ;;  %v1497_v41 = vld [vmem:[%s2631_s7] sm:$0x3] }
 0x190   :  { %v1301_v46 = vadd.f32 %v1300_v44, %v1299_v42  ;;  %v14_v42 = vstv %s2632_s8 }
 0x191   :  { %v1309_v47 = vrot.slane %v1308_v45, 1  ;;  %15 = vst [vmem:[#allocation2] sm:$0x1] %v14_v42 }
 0x192   :  { %v1311_v50 = vmul.f32 0.055555556, %v1301_v46 }
 0x193   :  { %v1310_v52 = vadd.f32 %v1309_v47, %v1308_v45 }
 0x194   :  { %v1314_v53 = vadd.f32 1e-05, %v1311_v50 }
 0x195   :  { %v1312_v54 = vmul.f32 0.055555556, %v1310_v52 }
 0x196   :  { %2022 = vrsqrt.f32 %v1314_v53 }
 0x197   :  { %v1315_v55 = vadd.f32 1e-05, %v1312_v54 }
 0x198   :  { %v1780_v50 = vld [vmem:[#allocation2] ss:$0 sm:$0xff] }
 0x199   :  { %2024 = vrsqrt.f32 %v1315_v55 }
 0x1a3   :  { %v2023_v59 = vpop.eup %2022 }
 0x1a6   :  { %v2025_v61 = vpop.eup %2024 }
 0x1a7   :  { %v1320_v62 = vcombine.low %v2023_v59, %v2025_v61 }
 0x1a9   :  { %v1327_v0 = vrot.slane %v1320_v62, %v1326_v60 }
 0x1ab   :  { %v1334_v2 = vrot.slane %v1327_v0, %v1326_v60 }
 0x1ad   :  { %v1336_v4 = vmul.f32 %v1334_v2, %v1313_v1 }
 0x1af   :  { %v1345_v6 = vrot.slane %v1336_v4, %v2592_v51  ;;  %v1341_v7 = vrot.slane %v1336_v4, %v2586_v49  ;;  %v1492_v49 = vpop.f32.mrf.mxu1 }
 0x1b1   :  { %v1353_v10 = vmul.f32 %v1345_v6, %v1286_v27  ;;  %v1348_v11 = vmul.f32 %v1341_v7, %v1281_v18  ;;  %v1349_v12 = vmul.f32 %v1345_v6, %v1282_v25  ;;  %v1350_v13 = vmul.f32 %v1341_v7, %v1283_v19  ;;  %v1494_v32 = vpop.f32.mrf.mxu1 }
 0x1b2   :  { %v1351_v14 = vmul.f32 %v1345_v6, %v1284_v26  ;;  %v1352_v15 = vmul.f32 %v1341_v7, %v1285_v20 }
 0x1b3   :  { %v1368_v22 = vadd.f32 %v1359_v48, %v1350_v13  ;;  %v1371_v23 = vadd.f32 %v1363_v8, %v1353_v10  ;;  %v1367_v24 = vadd.f32 %v1363_v8, %v1349_v12  ;;  %v1366_v28 = vadd.f32 %v1359_v48, %v1348_v11 }
 0x1b4   :  { %v1369_v16 = vadd.f32 %v1363_v8, %v1351_v14  ;;  %v1370_v21 = vadd.f32 %v1359_v48, %v1352_v15 }
 0x1b5   :  { %v1380_v31 = vmul.f32 0.01, %v1368_v22  ;;  %vm1377_vm5 = vcmp.gt.f32.partialorder %v1371_v23, 0.0  ;;  %v1379_v18 = vmul.f32 0.01, %v1367_v24  ;;  %vm1374_vm6 = vcmp.gt.f32.partialorder %v1368_v22, 0.0 }
 0x1b6   :  { %vm1376_vm3 = vcmp.gt.f32.partialorder %v1370_v21, 0.0  ;;  %v1382_v29 = vmul.f32 0.01, %v1370_v21  ;;  %v1381_v30 = vmul.f32 0.01, %v1369_v16  ;;  %vm1375_vm4 = vcmp.gt.f32.partialorder %v1369_v16, 0.0 }
 0x1b7   :  { %v1383_v19 = vmul.f32 0.01, %v1371_v23  ;;  %v1378_v25 = vmul.f32 0.01, %v1366_v28  ;;  %vm1373_vm7 = vcmp.gt.f32.partialorder %v1367_v24, 0.0  ;;  %vm1372_vm8 = vcmp.gt.f32.partialorder %v1366_v28, 0.0 }
 0x1b8   :  { %v1388_v51 = vsel %vm1376_vm3, %v1370_v21, %v1382_v29  ;;  %v1387_v20 = vsel %vm1375_vm4, %v1369_v16, %v1381_v30  ;;  %v1386_v33 = vsel %vm1374_vm6, %v1368_v22, %v1380_v31  ;;  %v1385_v35 = vsel %vm1373_vm7, %v1367_v24, %v1379_v18 }
 0x1b9   :  { %v1502_v26 = vmul.f32 %v1492_v49, %v1388_v51  ;;  %v1389_v27 = vsel %vm1377_vm5, %v1371_v23, %v1383_v19  ;;  %v1384_v36 = vsel %vm1372_vm8, %v1366_v28, %v1378_v25  ;;  %v1501_v37 = vmul.f32 %v1488_v17, %v1387_v20 }
 0x1ba   :  { %v1503_v34 = vmul.f32 %v1494_v32, %v1389_v27  ;;  %v1500_v38 = vmul.f32 %v1486_v9, %v1386_v33  ;;  %v1499_v39 = vmul.f32 %v1482_v3, %v1385_v35  ;;  %v1498_v40 = vmul.f32 %v1480_v63, %v1384_v36 }
 0x1bc   :  { %1777 = vmatprep.subr.msk.mxu1 %vm1260_vm2, %v1503_v34 }
 0x1bd   :  { %1778 = vmatpush1.msk.msra.mxu1 %vm1260_vm2, %v1502_v26 }
 0x1be   :  { %1542 = vmatprep.subr.mxu1 %v1501_v37 }
 0x1bf   :  { %1543 = vmatpush1.msra.mxu1 %v1500_v38 }
 0x1c0   :  { %1544 = vmatprep.subr.mxu1 %v1499_v39 }
 0x1c1   :  { %1545 = vmatpush1.msra.mxu1 %v1498_v40 }
 0x1c2   :  { %1779 = vmatmul.mubr.msk.f32.vlgmr.msra.gmra.mxu1 %vm1504_vm9, %v1497_v41 }
 0x282   :  { %v1580_v43 = vpop.f32.mrf.mxu1 }
 0x283   :  { %v1585_v45 = vsel %vm1260_vm2, %v1580_v43, 0.0 }
 0x284   :  { %v1582_v44 = vpop.f32.mrf.mxu1 }
 0x285   :  { %v1586_v46 = vsel %vm1260_vm2, %v1582_v44, 0.0 }
 0x286   :  { %v1587_v47 = vadd.f32 %v1586_v46, %v1585_v45 }
 0x288   :  { %1588 = vadd.xlane.f32.xlu0 %v1587_v47 }
 0x311   :  { %v1589_v52 = vpop.xlane.xlu0 %1588 }
 0x312   :  { %v1597_v53 = vadd.f32 %v1780_v50, %v1589_v52 }
 0x314   :  { %v1598_v54 = vsub.f32 0.0, %v1597_v53 }
 0x316   :  { %v1599_v55 = vmul.f32 1.442695, %v1598_v54 }
 0x318   :  { %2026 = vpow2.f32 %v1599_v55 }
 0x325   :  { %v2027_v56 = vpop.eup %2026 }
 0x326   :  { %v1601_v57 = vadd.f32 1.0, %v2027_v56 }
 0x328   :  { %2028 = vrcp.f32 %v1601_v57 }
 0x335   :  { %v2029_v58 = vpop.eup %2028 }
 0x336   :  { %1605 = vst.msk [vmem:[%s2633_s9] sm:$0x3] %vm1604_vm10, %v2029_v58 }

</bundles_post_ra>
